<compile_context>
chip_gen: v5e
topology: v5e:2x2
jax: 0.10.0
libtpu: 0.0.40
codegen_flags: <defaults>
</compile_context>

<pallas_src>
import jax
import jax.numpy as jnp
import numpy as np
from jax import lax
from jax.experimental import pallas as pl
from jax.experimental.pallas import tpu as pltpu

_BN_EPS = 1e-5


# ----------------------------- in-kernel helpers -----------------------------

def _bn_relu(h, gamma, beta, axis):
    """Training-mode BatchNorm over the pixel axis, fused with ReLU.

    h: 2-D with one channel axis and one pixel axis (`axis` = pixel axis).
    One-pass statistics: var = E[x^2] - mean^2 (biased, like PyTorch training).
    """
    cnt = jnp.float32(h.shape[axis])
    s = jnp.sum(h, axis=axis, keepdims=True)
    ss = jnp.sum(h * h, axis=axis, keepdims=True)
    mean = s / cnt
    var = ss / cnt - mean * mean
    inv = lax.rsqrt(var + _BN_EPS)
    return jnp.maximum((h - mean) * inv * gamma + beta, 0.0)


def _im2col_3x3(xp):
    """Zero-padded (N, Ho+2, Wo+2, C) -> (N*Ho*Wo, 9*C) patch matrix.

    Patch columns ordered (dy, dx, c), matching the reshaped HWIO weights.
    """
    N, Hp, Wp, C = xp.shape
    Ho, Wo = Hp - 2, Wp - 2
    M = N * Ho * Wo
    taps = [xp[:, dy:dy + Ho, dx:dx + Wo, :].reshape(M, C)
            for dy in range(3) for dx in range(3)]
    return jnp.concatenate(taps, axis=-1)                 # (M, 9*C)


# ------------------------------- fused kernel -------------------------------

def _down_fused_kernel(xw_ref, w1_ref, g1_ref, b1_ref, w2t_ref, g2_ref, b2_ref,
                       o_ref, xp1_ref, xp2_ref):
    # xw_ref : (2, 2, N, Ho, Wo, Cin)  pool-window offsets as leading dims
    # w1_ref : (9*Cin, Cmid)           im2col-reshaped conv1 weight (rows: dy,dx,cin)
    # w2t_ref: (Cout, 9*Cmid)          conv2 weight, pre-transposed (cols: dy,dx,cmid)
    # g1/b1  : (1, Cmid)   g2/b2: (Cout, 1)   BatchNorm affine parameters
    # o_ref  : (Cout, M) with M = N*Ho*Wo    lane-dense output slab
    # xp1/xp2: (N, Ho+2, Wo+2, C) VMEM scratch holding the 1-pixel zero halo
    N, Hp, Wp, Cin = xp1_ref.shape
    Ho, Wo = Hp - 2, Wp - 2
    Cmid = w1_ref.shape[1]

    # ---- MaxPool2d(2): max of the four statically indexed window slabs ----
    p = jnp.maximum(jnp.maximum(xw_ref[0, 0], xw_ref[0, 1]),
                    jnp.maximum(xw_ref[1, 0], xw_ref[1, 1]))   # (N, Ho, Wo, Cin)

    # ---- conv1: zero halo in VMEM scratch, im2col, single MXU matmul ----
    xp1_ref[...] = jnp.zeros(xp1_ref.shape, jnp.float32)
    xp1_ref[:, 1:Ho + 1, 1:Wo + 1, :] = p
    patches1 = _im2col_3x3(xp1_ref[...])                       # (M, 9*Cin)
    h1 = jnp.dot(patches1, w1_ref[...],
                 preferred_element_type=jnp.float32)           # (M, Cmid)

    # ---- BN1 (batch statistics over rows = pixels) + ReLU, in-register ----
    y1 = _bn_relu(h1, g1_ref[...], b1_ref[...], axis=0)        # (M, Cmid)

    # ---- conv2: halo scratch again, result produced with pixels in lanes ----
    xp2_ref[...] = jnp.zeros(xp2_ref.shape, jnp.float32)
    xp2_ref[:, 1:Ho + 1, 1:Wo + 1, :] = y1.reshape(N, Ho, Wo, Cmid)
    patches2 = _im2col_3x3(xp2_ref[...])                       # (M, 9*Cmid)
    # (Cout, 9*Cmid) x (M, 9*Cmid)^T -> (Cout, M): single MXU matmul, output
    # already in the lane-dense layout we want to store.
    h2 = lax.dot_general(w2t_ref[...], patches2,
                         (((1,), (1,)), ((), ())),
                         preferred_element_type=jnp.float32)   # (Cout, M)

    # ---- BN2 (stats over lanes = pixels) + ReLU, dense full-width store ----
    o_ref[...] = _bn_relu(h2, g2_ref[...], b2_ref[...], axis=1)


# --------------------------------- wrapper ----------------------------------

@jax.jit
def down_forward(x_nchw, params):
    x = x_nchw.astype(jnp.float32)
    N, Cin, H, W = x.shape
    Ho, Wo = H // 2, W // 2
    Cmid = params["w1"].shape[3]
    Cout = params["w2"].shape[3]
    M = N * Ho * Wo

    # Expose the 2x2 pool windows as two leading dims: (2, 2, N, Ho, Wo, Cin).
    # Replaces the old NCHW->NHWC transpose; XLA fuses reshape+transpose into
    # one small copy, and the kernel's input tiles become 4x denser.
    xw = jnp.transpose(x.reshape(N, Cin, Ho, 2, Wo, 2), (3, 5, 0, 2, 4, 1))

    # Weight / affine-parameter layout plumbing (tiny, done once outside).
    w1_2d = params["w1"].reshape(9 * Cin, Cmid)            # rows = (dy, dx, cin)
    w2_t = params["w2"].reshape(9 * Cmid, Cout).T          # (Cout, 9*Cmid)
    g1 = params["gamma1"].reshape(1, Cmid)
    b1 = params["beta1"].reshape(1, Cmid)
    g2 = params["gamma2"].reshape(Cout, 1)
    b2 = params["beta2"].reshape(Cout, 1)

    out_cm = pl.pallas_call(
        _down_fused_kernel,
        out_shape=jax.ShapeDtypeStruct((Cout, M), jnp.float32),
        scratch_shapes=[
            pltpu.VMEM((N, Ho + 2, Wo + 2, Cin), jnp.float32),
            pltpu.VMEM((N, Ho + 2, Wo + 2, Cmid), jnp.float32),
        ],
    )(xw, w1_2d, g1, b1, w2_t, g2, b2)

    # (Cout, N*Ho*Wo) -> (N, Cout, Ho, Wo): wrapper-side layout plumbing.
    return jnp.transpose(out_cm.reshape(Cout, N, Ho, Wo), (1, 0, 2, 3))


def init_params(key, in_channels, out_channels):
    # Down(in, out): DoubleConv(in, out) => mid_channels = out_channels.
    mid = out_channels
    k1, k2, k3, k4, k5, k6 = jax.random.split(key, 6)
    b1 = 1.0 / np.sqrt(in_channels * 9)
    b2 = 1.0 / np.sqrt(mid * 9)
    return {
        # PyTorch Conv2d weight is OIHW; we store HWIO directly.
        "w1": jax.random.uniform(k1, (3, 3, in_channels, mid), jnp.float32, -b1, b1),
        "gamma1": 1.0 + 0.1 * jax.random.normal(k2, (mid,), jnp.float32),
        "beta1": 0.1 * jax.random.normal(k3, (mid,), jnp.float32),
        "w2": jax.random.uniform(k4, (3, 3, mid, out_channels), jnp.float32, -b2, b2),
        "gamma2": 1.0 + 0.1 * jax.random.normal(k5, (out_channels,), jnp.float32),
        "beta2": 0.1 * jax.random.normal(k6, (out_channels,), jnp.float32),
    }


# ---------------------- pure-JAX reference (for checking) ----------------------

def _ref_bn_relu(x, gamma, beta):
    mean = jnp.mean(x, axis=(0, 1, 2), keepdims=True)
    var = jnp.mean((x - mean) ** 2, axis=(0, 1, 2), keepdims=True)
    y = (x - mean) * lax.rsqrt(var + _BN_EPS)
    y = y * gamma.reshape(1, 1, 1, -1) + beta.reshape(1, 1, 1, -1)
    return jnp.maximum(y, 0.0)


def down_ref(x_nchw, params):
    x = jnp.transpose(x_nchw, (0, 2, 3, 1)).astype(jnp.float32)
    N, H, W, C = x.shape
    x = jnp.max(x.reshape(N, H // 2, 2, W // 2, 2, C), axis=(2, 4))
    for w, g, b in ((params["w1"], params["gamma1"], params["beta1"]),
                    (params["w2"], params["gamma2"], params["beta2"])):
        x = lax.conv_general_dilated(
            x, w, window_strides=(1, 1), padding="SAME",
            dimension_numbers=("NHWC", "HWIO", "NHWC"),
            precision=lax.Precision.HIGHEST)
        x = _ref_bn_relu(x, g, b)
    return jnp.transpose(x, (0, 3, 1, 2))


if __name__ == "__main__":
    key = jax.random.PRNGKey(0)
    kx, kp = jax.random.split(key)
    in_channels, out_channels = 4, 8
    x = jax.random.normal(kx, (2, in_channels, 16, 16), jnp.float32)  # NCHW, like PyTorch
    params = init_params(kp, in_channels, out_channels)

    out = jax.block_until_ready(down_forward(x, params))
    ref = jax.block_until_ready(down_ref(x, params))

    assert out.shape == (2, out_channels, 8, 8), out.shape
    np.testing.assert_allclose(np.asarray(out), np.asarray(ref), rtol=2e-2, atol=2e-2)
    print("KERNEL_OK")
</pallas_src>

<mosaic_0001>
module attributes {stable_mosaic.version = 11 : i64} {
  func.func @_down_fused_kernel(%arg0: memref<2x2x2x8x8x4xf32, #tpu.memory_space<vmem>>, %arg1: memref<36x8xf32, #tpu.memory_space<vmem>>, %arg2: memref<1x8xf32, #tpu.memory_space<vmem>>, %arg3: memref<1x8xf32, #tpu.memory_space<vmem>>, %arg4: memref<8x72xf32, #tpu.memory_space<vmem>>, %arg5: memref<8x1xf32, #tpu.memory_space<vmem>>, %arg6: memref<8x1xf32, #tpu.memory_space<vmem>>, %arg7: memref<8x128xf32, #tpu.memory_space<vmem>>, %arg8: memref<2x10x10x4xf32, #tpu.memory_space<vmem>>, %arg9: memref<2x10x10x8xf32, #tpu.memory_space<vmem>>) attributes {dimension_semantics = [], scalar_prefetch = 0 : i64, scratch_operands = 2 : i64, tpu.core_type = #tpu.core_type<tc>} {
    %c0 = arith.constant 0 : index
    %c0_0 = arith.constant 0 : index
    %c0_1 = arith.constant 0 : index
    %c0_2 = arith.constant 0 : index
    %c0_3 = arith.constant 0 : index
    %c0_4 = arith.constant 0 : index
    %0 = vector.load %arg0[%c0, %c0_0, %c0_1, %c0_2, %c0_3, %c0_4] : memref<2x2x2x8x8x4xf32, #tpu.memory_space<vmem>>, vector<1x1x2x8x8x4xf32>
    %1 = vector.shape_cast %0 : vector<1x1x2x8x8x4xf32> to vector<2x8x8x4xf32>
    %c0_5 = arith.constant 0 : index
    %c1 = arith.constant 1 : index
    %c0_6 = arith.constant 0 : index
    %c0_7 = arith.constant 0 : index
    %c0_8 = arith.constant 0 : index
    %c0_9 = arith.constant 0 : index
    %2 = vector.load %arg0[%c0_5, %c1, %c0_6, %c0_7, %c0_8, %c0_9] : memref<2x2x2x8x8x4xf32, #tpu.memory_space<vmem>>, vector<1x1x2x8x8x4xf32>
    %3 = vector.shape_cast %2 : vector<1x1x2x8x8x4xf32> to vector<2x8x8x4xf32>
    %4 = arith.maximumf %1, %3 : vector<2x8x8x4xf32>
    %c1_10 = arith.constant 1 : index
    %c0_11 = arith.constant 0 : index
    %c0_12 = arith.constant 0 : index
    %c0_13 = arith.constant 0 : index
    %c0_14 = arith.constant 0 : index
    %c0_15 = arith.constant 0 : index
    %5 = vector.load %arg0[%c1_10, %c0_11, %c0_12, %c0_13, %c0_14, %c0_15] : memref<2x2x2x8x8x4xf32, #tpu.memory_space<vmem>>, vector<1x1x2x8x8x4xf32>
    %6 = vector.shape_cast %5 : vector<1x1x2x8x8x4xf32> to vector<2x8x8x4xf32>
    %c1_16 = arith.constant 1 : index
    %c1_17 = arith.constant 1 : index
    %c0_18 = arith.constant 0 : index
    %c0_19 = arith.constant 0 : index
    %c0_20 = arith.constant 0 : index
    %c0_21 = arith.constant 0 : index
    %7 = vector.load %arg0[%c1_16, %c1_17, %c0_18, %c0_19, %c0_20, %c0_21] : memref<2x2x2x8x8x4xf32, #tpu.memory_space<vmem>>, vector<1x1x2x8x8x4xf32>
    %8 = vector.shape_cast %7 : vector<1x1x2x8x8x4xf32> to vector<2x8x8x4xf32>
    %9 = arith.maximumf %6, %8 : vector<2x8x8x4xf32>
    %10 = arith.maximumf %4, %9 : vector<2x8x8x4xf32>
    %cst = arith.constant 0.000000e+00 : f32
    %11 = vector.broadcast %cst : f32 to vector<2x10x10x4xf32>
    %c0_22 = arith.constant 0 : index
    %c0_23 = arith.constant 0 : index
    %c0_24 = arith.constant 0 : index
    %c0_25 = arith.constant 0 : index
    %12 = vector.load %arg8[%c0_22, %c0_23, %c0_24, %c0_25] : memref<2x10x10x4xf32, #tpu.memory_space<vmem>>, vector<2x10x10x4xf32>
    tpu.vector_store %arg8[%c0_22, %c0_23, %c0_24, %c0_25], %11 {strides = array<i32>} : memref<2x10x10x4xf32, #tpu.memory_space<vmem>>, vector<2x10x10x4xf32>,
    %c0_26 = arith.constant 0 : index
    %c1_27 = arith.constant 1 : index
    %c1_28 = arith.constant 1 : index
    %c0_29 = arith.constant 0 : index
    %13 = vector.load %arg8[%c0_26, %c1_27, %c1_28, %c0_29] : memref<2x10x10x4xf32, #tpu.memory_space<vmem>>, vector<2x8x8x4xf32>
    tpu.vector_store %arg8[%c0_26, %c1_27, %c1_28, %c0_29], %10 {strides = array<i32>} : memref<2x10x10x4xf32, #tpu.memory_space<vmem>>, vector<2x8x8x4xf32>,
    %c0_30 = arith.constant 0 : index
    %c0_31 = arith.constant 0 : index
    %c0_32 = arith.constant 0 : index
    %c0_33 = arith.constant 0 : index
    %14 = vector.load %arg8[%c0_30, %c0_31, %c0_32, %c0_33] : memref<2x10x10x4xf32, #tpu.memory_space<vmem>>, vector<2x10x10x4xf32>
    %15 = vector.extract_strided_slice %14 {offsets = [0, 0, 0, 0], sizes = [2, 8, 8, 4], strides = [1, 1, 1, 1]} : vector<2x10x10x4xf32> to vector<2x8x8x4xf32>
    %16 = vector.shape_cast %15 : vector<2x8x8x4xf32> to vector<128x4xf32>
    %17 = vector.extract_strided_slice %14 {offsets = [0, 0, 1, 0], sizes = [2, 8, 8, 4], strides = [1, 1, 1, 1]} : vector<2x10x10x4xf32> to vector<2x8x8x4xf32>
    %18 = vector.shape_cast %17 : vector<2x8x8x4xf32> to vector<128x4xf32>
    %19 = vector.extract_strided_slice %14 {offsets = [0, 0, 2, 0], sizes = [2, 8, 8, 4], strides = [1, 1, 1, 1]} : vector<2x10x10x4xf32> to vector<2x8x8x4xf32>
    %20 = vector.shape_cast %19 : vector<2x8x8x4xf32> to vector<128x4xf32>
    %21 = vector.extract_strided_slice %14 {offsets = [0, 1, 0, 0], sizes = [2, 8, 8, 4], strides = [1, 1, 1, 1]} : vector<2x10x10x4xf32> to vector<2x8x8x4xf32>
    %22 = vector.shape_cast %21 : vector<2x8x8x4xf32> to vector<128x4xf32>
    %23 = vector.extract_strided_slice %14 {offsets = [0, 1, 1, 0], sizes = [2, 8, 8, 4], strides = [1, 1, 1, 1]} : vector<2x10x10x4xf32> to vector<2x8x8x4xf32>
    %24 = vector.shape_cast %23 : vector<2x8x8x4xf32> to vector<128x4xf32>
    %25 = vector.extract_strided_slice %14 {offsets = [0, 1, 2, 0], sizes = [2, 8, 8, 4], strides = [1, 1, 1, 1]} : vector<2x10x10x4xf32> to vector<2x8x8x4xf32>
    %26 = vector.shape_cast %25 : vector<2x8x8x4xf32> to vector<128x4xf32>
    %27 = vector.extract_strided_slice %14 {offsets = [0, 2, 0, 0], sizes = [2, 8, 8, 4], strides = [1, 1, 1, 1]} : vector<2x10x10x4xf32> to vector<2x8x8x4xf32>
    %28 = vector.shape_cast %27 : vector<2x8x8x4xf32> to vector<128x4xf32>
    %29 = vector.extract_strided_slice %14 {offsets = [0, 2, 1, 0], sizes = [2, 8, 8, 4], strides = [1, 1, 1, 1]} : vector<2x10x10x4xf32> to vector<2x8x8x4xf32>
    %30 = vector.shape_cast %29 : vector<2x8x8x4xf32> to vector<128x4xf32>
    %31 = vector.extract_strided_slice %14 {offsets = [0, 2, 2, 0], sizes = [2, 8, 8, 4], strides = [1, 1, 1, 1]} : vector<2x10x10x4xf32> to vector<2x8x8x4xf32>
    %32 = vector.shape_cast %31 : vector<2x8x8x4xf32> to vector<128x4xf32>
    %33 = tpu.concatenate %16, %18, %20, %22, %24, %26, %28, %30, %32 in 1 : vector<128x4xf32>, vector<128x4xf32>, vector<128x4xf32>, vector<128x4xf32>, vector<128x4xf32>, vector<128x4xf32>, vector<128x4xf32>, vector<128x4xf32>, vector<128x4xf32> -> vector<128x36xf32>
    %c0_34 = arith.constant 0 : index
    %c0_35 = arith.constant 0 : index
    %34 = vector.load %arg1[%c0_34, %c0_35] : memref<36x8xf32, #tpu.memory_space<vmem>>, vector<36x8xf32>
    %cst_36 = arith.constant dense<0.000000e+00> : vector<128x8xf32>
    %35 = tpu.matmul %33, %34, %cst_36 {dimension_numbers = #tpu.dot_dimension_numbers<[1], [0], [0], [1], [0, 0, 1, 1], [], []>} : vector<128x36xf32>, vector<36x8xf32>, vector<128x8xf32> -> vector<128x8xf32>
    %c0_37 = arith.constant 0 : index
    %c0_38 = arith.constant 0 : index
    %36 = vector.load %arg2[%c0_37, %c0_38] : memref<1x8xf32, #tpu.memory_space<vmem>>, vector<1x8xf32>
    %c0_39 = arith.constant 0 : index
    %c0_40 = arith.constant 0 : index
    %37 = vector.load %arg3[%c0_39, %c0_40] : memref<1x8xf32, #tpu.memory_space<vmem>>, vector<1x8xf32>
    %cst_41 = arith.constant dense<0.000000e+00> : vector<8xf32>
    %38 = vector.multi_reduction <add>, %35, %cst_41 [0] : vector<128x8xf32> to vector<8xf32>
    %39 = vector.shape_cast %38 : vector<8xf32> to vector<1x8xf32>
    %40 = arith.mulf %35, %35 : vector<128x8xf32>
    %cst_42 = arith.constant dense<0.000000e+00> : vector<8xf32>
    %41 = vector.multi_reduction <add>, %40, %cst_42 [0] : vector<128x8xf32> to vector<8xf32>
    %42 = vector.shape_cast %41 : vector<8xf32> to vector<1x8xf32>
    %cst_43 = arith.constant 1.280000e+02 : f32
    %43 = vector.broadcast %cst_43 : f32 to vector<1x8xf32>
    %44 = arith.divf %39, %43 : vector<1x8xf32>
    %cst_44 = arith.constant 1.280000e+02 : f32
    %45 = vector.broadcast %cst_44 : f32 to vector<1x8xf32>
    %46 = arith.divf %42, %45 : vector<1x8xf32>
    %47 = arith.mulf %44, %44 : vector<1x8xf32>
    %48 = arith.subf %46, %47 : vector<1x8xf32>
    %cst_45 = arith.constant 9.99999974E-6 : f32
    %49 = vector.broadcast %cst_45 : f32 to vector<1x8xf32>
    %50 = arith.addf %48, %49 : vector<1x8xf32>
    %51 = math.rsqrt %50 : vector<1x8xf32>
    %52 = vector.broadcast %44 : vector<1x8xf32> to vector<128x8xf32>
    %53 = arith.subf %35, %52 : vector<128x8xf32>
    %54 = vector.broadcast %51 : vector<1x8xf32> to vector<128x8xf32>
    %55 = arith.mulf %53, %54 : vector<128x8xf32>
    %56 = vector.broadcast %36 : vector<1x8xf32> to vector<128x8xf32>
    %57 = arith.mulf %55, %56 : vector<128x8xf32>
    %58 = vector.broadcast %37 : vector<1x8xf32> to vector<128x8xf32>
    %59 = arith.addf %57, %58 : vector<128x8xf32>
    %cst_46 = arith.constant 0.000000e+00 : f32
    %60 = vector.broadcast %cst_46 : f32 to vector<128x8xf32>
    %61 = arith.maximumf %59, %60 : vector<128x8xf32>
    %cst_47 = arith.constant 0.000000e+00 : f32
    %62 = vector.broadcast %cst_47 : f32 to vector<2x10x10x8xf32>
    %c0_48 = arith.constant 0 : index
    %c0_49 = arith.constant 0 : index
    %c0_50 = arith.constant 0 : index
    %c0_51 = arith.constant 0 : index
    %63 = vector.load %arg9[%c0_48, %c0_49, %c0_50, %c0_51] : memref<2x10x10x8xf32, #tpu.memory_space<vmem>>, vector<2x10x10x8xf32>
    tpu.vector_store %arg9[%c0_48, %c0_49, %c0_50, %c0_51], %62 {strides = array<i32>} : memref<2x10x10x8xf32, #tpu.memory_space<vmem>>, vector<2x10x10x8xf32>,
    %64 = vector.shape_cast %61 : vector<128x8xf32> to vector<2x8x8x8xf32>
    %c0_52 = arith.constant 0 : index
    %c1_53 = arith.constant 1 : index
    %c1_54 = arith.constant 1 : index
    %c0_55 = arith.constant 0 : index
    %65 = vector.load %arg9[%c0_52, %c1_53, %c1_54, %c0_55] : memref<2x10x10x8xf32, #tpu.memory_space<vmem>>, vector<2x8x8x8xf32>
    tpu.vector_store %arg9[%c0_52, %c1_53, %c1_54, %c0_55], %64 {strides = array<i32>} : memref<2x10x10x8xf32, #tpu.memory_space<vmem>>, vector<2x8x8x8xf32>,
    %c0_56 = arith.constant 0 : index
    %c0_57 = arith.constant 0 : index
    %c0_58 = arith.constant 0 : index
    %c0_59 = arith.constant 0 : index
    %66 = vector.load %arg9[%c0_56, %c0_57, %c0_58, %c0_59] : memref<2x10x10x8xf32, #tpu.memory_space<vmem>>, vector<2x10x10x8xf32>
    %67 = vector.extract_strided_slice %66 {offsets = [0, 0, 0, 0], sizes = [2, 8, 8, 8], strides = [1, 1, 1, 1]} : vector<2x10x10x8xf32> to vector<2x8x8x8xf32>
    %68 = vector.shape_cast %67 : vector<2x8x8x8xf32> to vector<128x8xf32>
    %69 = vector.extract_strided_slice %66 {offsets = [0, 0, 1, 0], sizes = [2, 8, 8, 8], strides = [1, 1, 1, 1]} : vector<2x10x10x8xf32> to vector<2x8x8x8xf32>
    %70 = vector.shape_cast %69 : vector<2x8x8x8xf32> to vector<128x8xf32>
    %71 = vector.extract_strided_slice %66 {offsets = [0, 0, 2, 0], sizes = [2, 8, 8, 8], strides = [1, 1, 1, 1]} : vector<2x10x10x8xf32> to vector<2x8x8x8xf32>
    %72 = vector.shape_cast %71 : vector<2x8x8x8xf32> to vector<128x8xf32>
    %73 = vector.extract_strided_slice %66 {offsets = [0, 1, 0, 0], sizes = [2, 8, 8, 8], strides = [1, 1, 1, 1]} : vector<2x10x10x8xf32> to vector<2x8x8x8xf32>
    %74 = vector.shape_cast %73 : vector<2x8x8x8xf32> to vector<128x8xf32>
    %75 = vector.extract_strided_slice %66 {offsets = [0, 1, 1, 0], sizes = [2, 8, 8, 8], strides = [1, 1, 1, 1]} : vector<2x10x10x8xf32> to vector<2x8x8x8xf32>
    %76 = vector.shape_cast %75 : vector<2x8x8x8xf32> to vector<128x8xf32>
    %77 = vector.extract_strided_slice %66 {offsets = [0, 1, 2, 0], sizes = [2, 8, 8, 8], strides = [1, 1, 1, 1]} : vector<2x10x10x8xf32> to vector<2x8x8x8xf32>
    %78 = vector.shape_cast %77 : vector<2x8x8x8xf32> to vector<128x8xf32>
    %79 = vector.extract_strided_slice %66 {offsets = [0, 2, 0, 0], sizes = [2, 8, 8, 8], strides = [1, 1, 1, 1]} : vector<2x10x10x8xf32> to vector<2x8x8x8xf32>
    %80 = vector.shape_cast %79 : vector<2x8x8x8xf32> to vector<128x8xf32>
    %81 = vector.extract_strided_slice %66 {offsets = [0, 2, 1, 0], sizes = [2, 8, 8, 8], strides = [1, 1, 1, 1]} : vector<2x10x10x8xf32> to vector<2x8x8x8xf32>
    %82 = vector.shape_cast %81 : vector<2x8x8x8xf32> to vector<128x8xf32>
    %83 = vector.extract_strided_slice %66 {offsets = [0, 2, 2, 0], sizes = [2, 8, 8, 8], strides = [1, 1, 1, 1]} : vector<2x10x10x8xf32> to vector<2x8x8x8xf32>
    %84 = vector.shape_cast %83 : vector<2x8x8x8xf32> to vector<128x8xf32>
    %85 = tpu.concatenate %68, %70, %72, %74, %76, %78, %80, %82, %84 in 1 : vector<128x8xf32>, vector<128x8xf32>, vector<128x8xf32>, vector<128x8xf32>, vector<128x8xf32>, vector<128x8xf32>, vector<128x8xf32>, vector<128x8xf32>, vector<128x8xf32> -> vector<128x72xf32>
    %c0_60 = arith.constant 0 : index
    %c0_61 = arith.constant 0 : index
    %86 = vector.load %arg4[%c0_60, %c0_61] : memref<8x72xf32, #tpu.memory_space<vmem>>, vector<8x72xf32>
    %cst_62 = arith.constant dense<0.000000e+00> : vector<8x128xf32>
    %87 = tpu.matmul %86, %85, %cst_62 {dimension_numbers = #tpu.dot_dimension_numbers<[1], [1], [0], [0], [0, 0, 1, 0], [], []>} : vector<8x72xf32>, vector<128x72xf32>, vector<8x128xf32> -> vector<8x128xf32>
    %c0_63 = arith.constant 0 : index
    %c0_64 = arith.constant 0 : index
    %88 = vector.load %arg5[%c0_63, %c0_64] : memref<8x1xf32, #tpu.memory_space<vmem>>, vector<8x1xf32>
    %c0_65 = arith.constant 0 : index
    %c0_66 = arith.constant 0 : index
    %89 = vector.load %arg6[%c0_65, %c0_66] : memref<8x1xf32, #tpu.memory_space<vmem>>, vector<8x1xf32>
    %cst_67 = arith.constant dense<0.000000e+00> : vector<8xf32>
    %90 = vector.multi_reduction <add>, %87, %cst_67 [1] : vector<8x128xf32> to vector<8xf32>
    %91 = vector.shape_cast %90 : vector<8xf32> to vector<8x1xf32>
    %92 = arith.mulf %87, %87 : vector<8x128xf32>
    %cst_68 = arith.constant dense<0.000000e+00> : vector<8xf32>
    %93 = vector.multi_reduction <add>, %92, %cst_68 [1] : vector<8x128xf32> to vector<8xf32>
    %94 = vector.shape_cast %93 : vector<8xf32> to vector<8x1xf32>
    %cst_69 = arith.constant 1.280000e+02 : f32
    %95 = vector.broadcast %cst_69 : f32 to vector<8x1xf32>
    %96 = arith.divf %91, %95 : vector<8x1xf32>
    %cst_70 = arith.constant 1.280000e+02 : f32
    %97 = vector.broadcast %cst_70 : f32 to vector<8x1xf32>
    %98 = arith.divf %94, %97 : vector<8x1xf32>
    %99 = arith.mulf %96, %96 : vector<8x1xf32>
    %100 = arith.subf %98, %99 : vector<8x1xf32>
    %cst_71 = arith.constant 9.99999974E-6 : f32
    %101 = vector.broadcast %cst_71 : f32 to vector<8x1xf32>
    %102 = arith.addf %100, %101 : vector<8x1xf32>
    %103 = math.rsqrt %102 : vector<8x1xf32>
    %104 = vector.broadcast %96 : vector<8x1xf32> to vector<8x128xf32>
    %105 = arith.subf %87, %104 : vector<8x128xf32>
    %106 = vector.broadcast %103 : vector<8x1xf32> to vector<8x128xf32>
    %107 = arith.mulf %105, %106 : vector<8x128xf32>
    %108 = vector.broadcast %88 : vector<8x1xf32> to vector<8x128xf32>
    %109 = arith.mulf %107, %108 : vector<8x128xf32>
    %110 = vector.broadcast %89 : vector<8x1xf32> to vector<8x128xf32>
    %111 = arith.addf %109, %110 : vector<8x128xf32>
    %cst_72 = arith.constant 0.000000e+00 : f32
    %112 = vector.broadcast %cst_72 : f32 to vector<8x128xf32>
    %113 = arith.maximumf %111, %112 : vector<8x128xf32>
    %c0_73 = arith.constant 0 : index
    %c0_74 = arith.constant 0 : index
    %114 = vector.load %arg7[%c0_73, %c0_74] : memref<8x128xf32, #tpu.memory_space<vmem>>, vector<8x128xf32>
    tpu.vector_store %arg7[%c0_73, %c0_74], %113 {strides = array<i32>} : memref<8x128xf32, #tpu.memory_space<vmem>>, vector<8x128xf32>,
    return
  }
}

</mosaic_0001>

<bundles_post_ra>
// kernel: down_forward.1
= control target key start
LH: loop header
LB: loop body
LE: loop exit
PB: predicated region body
PF: predicated region fallthrough
CT: control target
= control target key end

     0   :  { %vm141_vm0 = vcmask 31744   ;;  %vm143_vm1 = vcmask 25600   ;;  %v4474_v0 = vmov 0.0   ;;  %vm272_vm2 = vcmask 1046528   ;;  %s2257_s24 = smov 4   ;;  %s2258_s27 = smov 8   ;;  %s4466_s0 = inlined_call_operand.vmem [shape: f32[2,2,2,8,8,4], index: 0, kind: input, shape index: {}]   ;;  %s4467_s1 = inlined_call_operand.vmem [shape: f32[36,8], index: 1, kind: input, shape index: {}]   ;;  %s4468_s2 = inlined_call_operand.vmem [shape: f32[1,8], index: 2, kind: input, shape index: {}]   ;;  %s4469_s3 = inlined_call_operand.vmem [shape: f32[1,8], index: 3, kind: input, shape index: {}]   ;;  %s4470_s4 = inlined_call_operand.vmem [shape: f32[8,72], index: 4, kind: input, shape index: {}]   ;;  %s4471_s5 = inlined_call_operand.vmem [shape: f32[8,1], index: 5, kind: input, shape index: {}]   ;;  %s4472_s6 = inlined_call_operand.vmem [shape: f32[8,1], index: 6, kind: input, shape index: {}]   ;;  %s4473_s7 = inlined_call_operand.vmem [shape: f32[8,128], index: 7, kind: output, shape index: {}]  }
   0x1   :  { %163 = vst.msk [vmem:[#allocation2 + $0xa0] sm:$0xff] %vm141_vm0, %v4474_v0  ;;  %v27_v11 = vld [vmem:[%s4466_s0 + $0x8] sm:$0xff]  ;;  %v29_v15 = vld [vmem:[%s4466_s0 + $0x18] sm:$0xff]  ;;  %v26_v19 = vld [vmem:[%s4466_s0] sm:$0xff]  ;;  %vm321_vm3 = vcmask 1045504   ;;  %s2259_s20 = smov 12  }
   0x2   :  { %164 = vst.msk [vmem:[#allocation2 + $0xa8] sm:$0x3] %vm143_vm1, %v4474_v0  ;;  %v2134_v12 = vld [vmem:[%s4466_s0 + $0x88] sm:$0xff]  ;;  %v2136_v16 = vld [vmem:[%s4466_s0 + $0x98] sm:$0xff]  ;;  %v2133_v20 = vld [vmem:[%s4466_s0 + $0x80] sm:$0xff]  ;;  %vm802_vm4 = vcmask 64512  }
   0x3   :  { %142 = vst.msk [vmem:[#allocation2] sm:$0xff] %vm141_vm0, %v4474_v0  ;;  %v2150_v13 = vld [vmem:[%s4466_s0 + $0x108] sm:$0xff]  ;;  %v2152_v17 = vld [vmem:[%s4466_s0 + $0x118] sm:$0xff]  ;;  %v2149_v21 = vld [vmem:[%s4466_s0 + $0x100] sm:$0xff]  ;;  %v60_v31 = vmax.f32 %v27_v11, %v2134_v12  ;;  %v62_v37 = vmax.f32 %v29_v15, %v2136_v16  ;;  %v59_v39 = vmax.f32 %v26_v19, %v2133_v20  ;;  %s2261_s21 = smov 20   ;;  %s2262_s22 = smov 32  }
   0x4   :  { %144 = vst.msk [vmem:[#allocation2 + $0x8] sm:$0x3] %vm143_vm1, %v4474_v0  ;;  %v2166_v14 = vld [vmem:[%s4466_s0 + $0x188] sm:$0xff]  ;;  %v2168_v18 = vld [vmem:[%s4466_s0 + $0x198] sm:$0xff]  ;;  %v2165_v22 = vld [vmem:[%s4466_s0 + $0x180] sm:$0xff]  ;;  %s2263_s23 = smov 24  }
   0x5   :  { %145 = vst.msk [vmem:[#allocation2 + $0x10] sm:$0xff] %vm141_vm0, %v4474_v0  ;;  %v2428_v23 = vld [vmem:[%s4466_s0 + $0x10] sm:$0xff]  ;;  %v2444_v27 = vld [vmem:[%s4466_s0 + $0x20] sm:$0xff]  ;;  %v110_v32 = vmax.f32 %v2150_v13, %v2166_v14  ;;  %v2460_v33 = vld [vmem:[%s4466_s0 + $0x28] sm:$0xff]  ;;  %v112_v38 = vmax.f32 %v2152_v17, %v2168_v18  ;;  %v109_v40 = vmax.f32 %v2149_v21, %v2165_v22  ;;  %s2264_s25 = smov 28   ;;  %vm975_vm5 = vcmask 1043456  }
   0x6   :  { %146 = vst.msk [vmem:[#allocation2 + $0x18] sm:$0x3] %vm143_vm1, %v4474_v0  ;;  %v2135_v24 = vld [vmem:[%s4466_s0 + $0x90] sm:$0xff]  ;;  %v2137_v28 = vld [vmem:[%s4466_s0 + $0xa0] sm:$0xff]  ;;  %v2138_v34 = vld [vmem:[%s4466_s0 + $0xa8] sm:$0xff]  ;;  %vm819_vm6 = vcmask 97280  }
   0x7   :  { %147 = vst.msk [vmem:[#allocation2 + $0x20] sm:$0xff] %vm141_vm0, %v4474_v0  ;;  %v2151_v25 = vld [vmem:[%s4466_s0 + $0x110] sm:$0xff]  ;;  %v2153_v29 = vld [vmem:[%s4466_s0 + $0x120] sm:$0xff]  ;;  %v2154_v35 = vld [vmem:[%s4466_s0 + $0x128] sm:$0xff]  ;;  %v61_v49 = vmax.f32 %v2428_v23, %v2135_v24  ;;  %v126_v55 = vmax.f32 %v60_v31, %v110_v32  ;;  %v63_v56 = vmax.f32 %v2444_v27, %v2137_v28  ;;  %v128_v62 = vmax.f32 %v62_v37, %v112_v38  ;;  %s2268_s15 = smov 64   ;;  %s2269_s16 = smov 56  }
   0x8   :  { %v2325_v1 = vld [vmem:[#allocation2 + $0xa0] sm:$0xff]  ;;  %148 = vst.msk [vmem:[#allocation2 + $0x28] sm:$0x3] %vm143_vm1, %v4474_v0  ;;  %v2167_v26 = vld [vmem:[%s4466_s0 + $0x190] sm:$0xff]  ;;  %v2170_v36 = vld [vmem:[%s4466_s0 + $0x1a8] sm:$0xff]  ;;  %v125_v63 = vmax.f32 %v59_v39, %v109_v40  ;;  %vm836_vm7 = vcmask 130048  }
   0x9   :  { %v2329_v2 = vld [vmem:[#allocation2 + $0xa8] sm:$0x3]  ;;  %v297_v3 = vrot.slane %v2325_v1, 1  ;;  %149 = vst.msk [vmem:[#allocation2 + $0x30] sm:$0xff] %vm141_vm0, %v4474_v0  ;;  %v2169_v30 = vld [vmem:[%s4466_s0 + $0x1a0] sm:$0xff]  ;;  %v32_v41 = vld [vmem:[%s4466_s0 + $0x30] sm:$0xff]  ;;  %v111_v50 = vmax.f32 %v2151_v25, %v2167_v26 }
   0xa   :  { %v298_v4 = vrot.slane %v2329_v2, 1  ;;  %150 = vst.msk [vmem:[#allocation2 + $0x38] sm:$0x3] %vm143_vm1, %v4474_v0  ;;  %v2337_v5 = vld [vmem:[#allocation2] sm:$0xff]  ;;  %v2139_v42 = vld [vmem:[%s4466_s0 + $0xb0] sm:$0xff]  ;;  %v113_v57 = vmax.f32 %v2153_v29, %v2169_v30  ;;  %v35_v58 = vld [vmem:[%s4466_s0 + $0x48] sm:$0xff] }
   0xb   :  { %151 = vst.msk [vmem:[#allocation2 + $0x40] sm:$0xff] %vm141_vm0, %v4474_v0  ;;  %v2341_v6 = vld [vmem:[#allocation2 + $0x8] sm:$0x3]  ;;  %v273_v7 = vrot.slane %v2337_v5, 1  ;;  %v2155_v43 = vld [vmem:[%s4466_s0 + $0x130] sm:$0xff]  ;;  %v34_v51 = vld [vmem:[%s4466_s0 + $0x40] sm:$0xff]  ;;  %v127_v17 = vmax.f32 %v61_v49, %v111_v50 }
   0xc   :  { %v299_v8 = vsel %vm272_vm2, %v297_v3, %v298_v4  ;;  %152 = vst.msk [vmem:[#allocation2 + $0x48] sm:$0x3] %vm143_vm1, %v4474_v0  ;;  %v274_v9 = vrot.slane %v2341_v6, 1  ;;  %v2171_v44 = vld [vmem:[%s4466_s0 + $0x1b0] sm:$0xff]  ;;  %v2141_v52 = vld [vmem:[%s4466_s0 + $0xc0] sm:$0xff]  ;;  %v2142_v59 = vld [vmem:[%s4466_s0 + $0xc8] sm:$0xff]  ;;  %v64_v3 = vmax.f32 %v2460_v33, %v2138_v34  ;;  %v114_v4 = vmax.f32 %v2154_v35, %v2170_v36 }
   0xd   :  { %418 = vrot.lane.b32.xlu2 %v299_v8, %s2257_s24  ;;  %153 = vst.msk [vmem:[#allocation2 + $0x50] sm:$0xff] %vm141_vm0, %v4474_v0  ;;  %v36_v45 = vld [vmem:[%s4466_s0 + $0x50] sm:$0xff]  ;;  %v2157_v53 = vld [vmem:[%s4466_s0 + $0x140] sm:$0xff]  ;;  %v2158_v60 = vld [vmem:[%s4466_s0 + $0x148] sm:$0xff]  ;;  %v115_v11 = vmax.f32 %v2155_v43, %v2171_v44  ;;  %v129_v21 = vmax.f32 %v63_v56, %v113_v57  ;;  %v67_v22 = vmax.f32 %v34_v51, %v2141_v52  ;;  %vm870_vm8 = vcmask 195584  }
   0xe   :  { %154 = vst.msk [vmem:[#allocation2 + $0x58] sm:$0x3] %vm143_vm1, %v4474_v0  ;;  %v275_v10 = vsel %vm272_vm2, %v273_v7, %v274_v9  ;;  %v2143_v46 = vld [vmem:[%s4466_s0 + $0xd0] sm:$0xff]  ;;  %v2173_v54 = vld [vmem:[%s4466_s0 + $0x1c0] sm:$0xff]  ;;  %v2174_v61 = vld [vmem:[%s4466_s0 + $0x1c8] sm:$0xff]  ;;  %v130_v27 = vmax.f32 %v64_v3, %v114_v4  ;;  %v68_v28 = vmax.f32 %v35_v58, %v2142_v59  ;;  %vm853_vm9 = vcmask 162816  }
   0xf   :  { %155 = vst.msk [vmem:[#allocation2 + $0x60] sm:$0xff] %vm141_vm0, %v4474_v0  ;;  %402 = vrot.lane.b32.xlu0 %v275_v10, %s2257_s24  ;;  %v2159_v47 = vld [vmem:[%s4466_s0 + $0x150] sm:$0xff]  ;;  %v39_v7 = vld [vmem:[%s4466_s0 + $0x68] sm:$0xff]  ;;  %v65_v10 = vmax.f32 %v32_v41, %v2139_v42  ;;  %v69_v12 = vmax.f32 %v36_v45, %v2143_v46  ;;  %v37_v15 = vld [vmem:[%s4466_s0 + $0x58] sm:$0xff]  ;;  %v117_v23 = vmax.f32 %v2157_v53, %v2173_v54  ;;  %vm887_vm10 = vcmask 228352  }
  0x10   :  { %156 = vst.msk [vmem:[#allocation2 + $0x68] sm:$0x3] %vm143_vm1, %v4474_v0  ;;  %v2175_v48 = vld [vmem:[%s4466_s0 + $0x1d0] sm:$0xff]  ;;  %v2146_v8 = vld [vmem:[%s4466_s0 + $0xe8] sm:$0xff]  ;;  %v2144_v16 = vld [vmem:[%s4466_s0 + $0xd8] sm:$0xff]  ;;  %v118_v29 = vmax.f32 %v2158_v60, %v2174_v61  ;;  %vm904_vm11 = vcmask 261120  }
  0x11   :  { %157 = vst.msk [vmem:[#allocation2 + $0x70] sm:$0xff] %vm141_vm0, %v4474_v0  ;;  %v2162_v9 = vld [vmem:[%s4466_s0 + $0x168] sm:$0xff]  ;;  %v119_v13 = vmax.f32 %v2159_v47, %v2175_v48  ;;  %v2160_v18 = vld [vmem:[%s4466_s0 + $0x158] sm:$0xff]  ;;  %v38_v20 = vld [vmem:[%s4466_s0 + $0x60] sm:$0xff]  ;;  %v131_v30 = vmax.f32 %v65_v10, %v115_v11  ;;  %v72_v32 = vmax.f32 %v39_v7, %v2146_v8  ;;  %v70_v34 = vmax.f32 %v37_v15, %v2144_v16 }
  0x12   :  { %158 = vst.msk [vmem:[#allocation2 + $0x78] sm:$0x3] %vm143_vm1, %v4474_v0  ;;  %v2178_v14 = vld [vmem:[%s4466_s0 + $0x1e8] sm:$0xff]  ;;  %v2176_v19 = vld [vmem:[%s4466_s0 + $0x1d8] sm:$0xff]  ;;  %v2145_v24 = vld [vmem:[%s4466_s0 + $0xe0] sm:$0xff]  ;;  %v133_v38 = vmax.f32 %v67_v22, %v117_v23  ;;  %v134_v40 = vmax.f32 %v68_v28, %v118_v29  ;;  %vm926_vm12 = vcmask 293888  }
  0x13   :  { %159 = vst.msk [vmem:[#allocation2 + $0x80] sm:$0xff] %vm141_vm0, %v4474_v0  ;;  %v2161_v25 = vld [vmem:[%s4466_s0 + $0x160] sm:$0xff]  ;;  %v135_v31 = vmax.f32 %v69_v12, %v119_v13  ;;  %v122_v33 = vmax.f32 %v2162_v9, %v2178_v14  ;;  %v120_v35 = vmax.f32 %v2160_v18, %v2176_v19  ;;  %v71_v36 = vmax.f32 %v38_v20, %v2145_v24  ;;  %v40_v39 = vld [vmem:[%s4466_s0 + $0x70] sm:$0xff] }
  0x14   :  { %160 = vst.msk [vmem:[#allocation2 + $0x88] sm:$0x3] %vm143_vm1, %v4474_v0  ;;  %v2177_v26 = vld [vmem:[%s4466_s0 + $0x1e0] sm:$0xff]  ;;  %v2147_v41 = vld [vmem:[%s4466_s0 + $0xf0] sm:$0xff]  ;;  %vm1245_vm13 = vcmask 58368  }
  0x15   :  { %161 = vst.msk [vmem:[#allocation2 + $0x90] sm:$0xff] %vm141_vm0, %v4474_v0  ;;  %v121_v37 = vmax.f32 %v2161_v25, %v2177_v26  ;;  %v2163_v42 = vld [vmem:[%s4466_s0 + $0x170] sm:$0xff]  ;;  %v138_v44 = vmax.f32 %v72_v32, %v122_v33  ;;  %v136_v47 = vmax.f32 %v70_v34, %v120_v35  ;;  %v73_v53 = vmax.f32 %v40_v39, %v2147_v41 }
  0x16   :  { %162 = vst.msk [vmem:[#allocation2 + $0x98] sm:$0x3] %vm143_vm1, %v4474_v0  ;;  %v2179_v43 = vld [vmem:[%s4466_s0 + $0x1f0] sm:$0xff] }
  0x17   :  { %165 = vst.msk [vmem:[#allocation2 + $0xb0] sm:$0xff] %vm141_vm0, %v4474_v0  ;;  %v137_v48 = vmax.f32 %v71_v36, %v121_v37  ;;  %v123_v54 = vmax.f32 %v2163_v42, %v2179_v43 }
  0x18   :  { %166 = vst.msk [vmem:[#allocation2 + $0xb8] sm:$0x3] %vm143_vm1, %v4474_v0 }
  0x19   :  { %167 = vst.msk [vmem:[#allocation2 + $0xc0] sm:$0xff] %vm141_vm0, %v4474_v0  ;;  %v139_v13 = vmax.f32 %v73_v53, %v123_v54 }
  0x1a   :  { %168 = vst.msk [vmem:[#allocation2 + $0xc8] sm:$0x3] %vm143_vm1, %v4474_v0 }
  0x1b   :  { %169 = vst.msk [vmem:[#allocation2 + $0xd0] sm:$0xff] %vm141_vm0, %v4474_v0 }
  0x1c   :  { %170 = vst.msk [vmem:[#allocation2 + $0xd8] sm:$0x3] %vm143_vm1, %v4474_v0 }
  0x1d   :  { %171 = vst.msk [vmem:[#allocation2 + $0xe0] sm:$0xff] %vm141_vm0, %v4474_v0 }
  0x1e   :  { %172 = vst.msk [vmem:[#allocation2 + $0xe8] sm:$0x3] %vm143_vm1, %v4474_v0 }
  0x1f   :  { %173 = vst.msk [vmem:[#allocation2 + $0xf0] sm:$0xff] %vm141_vm0, %v4474_v0 }
  0x20   :  { %174 = vst.msk [vmem:[#allocation2 + $0xf8] sm:$0x3] %vm143_vm1, %v4474_v0 }
  0x21   :  { %175 = vst.msk [vmem:[#allocation2 + $0x100] sm:$0xff] %vm141_vm0, %v4474_v0 }
  0x22   :  { %176 = vst.msk [vmem:[#allocation2 + $0x108] sm:$0x3] %vm143_vm1, %v4474_v0 }
  0x23   :  { %177 = vst.msk [vmem:[#allocation2 + $0x110] sm:$0xff] %vm141_vm0, %v4474_v0 }
  0x24   :  { %178 = vst.msk [vmem:[#allocation2 + $0x118] sm:$0x3] %vm143_vm1, %v4474_v0 }
  0x25   :  { %179 = vst.msk [vmem:[#allocation2 + $0x120] sm:$0xff] %vm141_vm0, %v4474_v0 }
  0x26   :  { %180 = vst.msk [vmem:[#allocation2 + $0x128] sm:$0x3] %vm143_vm1, %v4474_v0 }
  0x27   :  { %181 = vst.msk [vmem:[#allocation2 + $0x130] sm:$0xff] %vm141_vm0, %v4474_v0 }
  0x28   :  { %182 = vst.msk [vmem:[#allocation2 + $0x138] sm:$0x3] %vm143_vm1, %v4474_v0 }
  0x29   :  { %185 = vst.msk [vmem:[#allocation2 + $0x21] sm:$0xff] %vm141_vm0, %v126_v55 }
  0x2a   :  { %187 = vst.msk [vmem:[#allocation2 + $0x41] sm:$0xff] %vm141_vm0, %v128_v62 }
  0x2b   :  { %184 = vst.msk [vmem:[#allocation2 + $0x11] sm:$0xff] %vm141_vm0, %v125_v63 }
  0x2c   :  { %186 = vst.msk [vmem:[#allocation2 + $0x31] sm:$0xff] %vm141_vm0, %v127_v17 }
  0x2d   :  { %188 = vst.msk [vmem:[#allocation2 + $0x51] sm:$0xff] %vm141_vm0, %v129_v21 }
  0x2e   :  { %189 = vst.msk [vmem:[#allocation2 + $0x61] sm:$0xff] %vm141_vm0, %v130_v27 }
  0x2f   :  { %190 = vst.msk [vmem:[#allocation2 + $0x71] sm:$0xff] %vm141_vm0, %v131_v30 }
  0x30   :  { %v2591_v45 = vld [vmem:[#allocation2 + $0x20] sm:$0xff]  ;;  %v2593_v46 = vld [vmem:[#allocation2 + $0x28] sm:$0x3]  ;;  %194 = vst.msk [vmem:[#allocation2 + $0xd1] sm:$0xff] %vm141_vm0, %v135_v31 }
  0x31   :  { %v279_v49 = vrot.slane %v2591_v45, 1  ;;  %v280_v50 = vrot.slane %v2593_v46, 1  ;;  %v2598_v51 = vld [vmem:[#allocation2 + $0x40] sm:$0xff]  ;;  %v2600_v52 = vld [vmem:[#allocation2 + $0x48] sm:$0x3]  ;;  %192 = vst.msk [vmem:[#allocation2 + $0xb1] sm:$0xff] %vm141_vm0, %v133_v38 }
  0x32   :  { %v285_v55 = vrot.slane %v2598_v51, 1  ;;  %v286_v56 = vrot.slane %v2600_v52, 1  ;;  %v2605_v57 = vld [vmem:[#allocation2 + $0x10] sm:$0xff]  ;;  %v2607_v58 = vld [vmem:[#allocation2 + $0x18] sm:$0x3]  ;;  %193 = vst.msk [vmem:[#allocation2 + $0xc1] sm:$0xff] %vm141_vm0, %v134_v40 }
  0x33   :  { %v2611_v59 = vsel %vm272_vm2, %v279_v49, %v280_v50  ;;  %v276_v60 = vrot.slane %v2605_v57, 1  ;;  %v277_v61 = vrot.slane %v2607_v58, 1  ;;  %v2615_v62 = vld [vmem:[#allocation2 + $0x30] sm:$0xff]  ;;  %v2617_v63 = vld [vmem:[#allocation2 + $0x38] sm:$0x3]  ;;  %197 = vst.msk [vmem:[#allocation2 + $0x101] sm:$0xff] %vm141_vm0, %v138_v44 }
  0x34   :  { %4481 = vst [vmem:[#allocation4_spill] sm:$0xff] %v2615_v62  ;;  %406 = vrot.lane.b32.xlu1 %v2611_v59, %s2257_s24  ;;  %v2623_v3 = vsel %vm272_vm2, %v285_v55, %v286_v56  ;;  %v2625_v4 = vld [vmem:[#allocation2 + $0x50] sm:$0xff]  ;;  %v2627_v7 = vld [vmem:[#allocation2 + $0x58] sm:$0x3]  ;;  %v282_v9 = vrot.slane %v2615_v62, 1  ;;  %v283_v10 = vrot.slane %v2617_v63, 1 }
  0x35   :  { %195 = vst.msk [vmem:[#allocation2 + $0xe1] sm:$0xff] %vm141_vm0, %v136_v47  ;;  %410 = vrot.lane.b32.xlu2 %v2623_v3, %s2257_s24  ;;  %v2633_v8 = vsel %vm272_vm2, %v276_v60, %v277_v61  ;;  %v2637_v11 = vld [vmem:[#allocation2 + $0x60] sm:$0xff]  ;;  %v2639_v12 = vld [vmem:[#allocation2 + $0x68] sm:$0x3]  ;;  %v288_v14 = vrot.slane %v2625_v4, 1  ;;  %v289_v15 = vrot.slane %v2627_v7, 1 }
  0x36   :  { %196 = vst.msk [vmem:[#allocation2 + $0xf1] sm:$0xff] %vm141_vm0, %v137_v48  ;;  %404 = vrot.lane.b32.xlu0 %v2633_v8, %s2257_s24  ;;  %v291_v16 = vrot.slane %v2637_v11, 1  ;;  %v292_v17 = vrot.slane %v2639_v12, 1  ;;  %v2649_v18 = vsel %vm272_vm2, %v282_v9, %v283_v10  ;;  %v2655_v20 = vld [vmem:[#allocation2 + $0x70] sm:$0xff]  ;;  %v2657_v21 = vld [vmem:[#allocation2 + $0x78] sm:$0x3] }
  0x37   :  { %198 = vst.msk [vmem:[#allocation2 + $0x111] sm:$0xff] %vm141_vm0, %v139_v13  ;;  %v2653_v19 = vsel %vm272_vm2, %v288_v14, %v289_v15  ;;  %v2662_v23 = vld [vmem:[#allocation2 + $0xd0] sm:$0xff]  ;;  %v2664_v24 = vld [vmem:[#allocation2 + $0xd8] sm:$0x3]  ;;  %v294_v27 = vrot.slane %v2655_v20, 1  ;;  %v295_v28 = vrot.slane %v2657_v21, 1 }
  0x38   :  { %v2660_v22 = vsel %vm272_vm2, %v291_v16, %v292_v17  ;;  %v2668_v25 = vld [vmem:[#allocation2 + $0xb0] sm:$0xff]  ;;  %v2670_v26 = vld [vmem:[#allocation2 + $0xb8] sm:$0x3]  ;;  %v306_v29 = vrot.slane %v2662_v23, 1  ;;  %v307_v30 = vrot.slane %v2664_v24, 1  ;;  %v325_v13 = vrot.slane %v2605_v57, 2 }
  0x39   :  { %4482 = vst [vmem:[#allocation5_spill] sm:$0xff] %v2668_v25  ;;  %v300_v31 = vrot.slane %v2668_v25, 1  ;;  %v301_v32 = vrot.slane %v2670_v26, 1  ;;  %v2683_v33 = vsel %vm272_vm2, %v294_v27, %v295_v28  ;;  %v2688_v35 = vld [vmem:[#allocation2 + $0xc0] sm:$0xff]  ;;  %v2690_v36 = vld [vmem:[#allocation2 + $0xc8] sm:$0x3] }
  0x3a   :  { %v2686_v34 = vsel %vm272_vm2, %v306_v29, %v307_v30  ;;  %v2695_v38 = vld [vmem:[#allocation2 + $0x100] sm:$0xff]  ;;  %v2697_v39 = vld [vmem:[#allocation2 + $0x108] sm:$0x3]  ;;  %v303_v42 = vrot.slane %v2688_v35, 1  ;;  %v304_v43 = vrot.slane %v2690_v36, 1  ;;  %v326_v14 = vrot.slane %v2607_v58, 2 }
  0x3b   :  { %v2693_v37 = vsel %vm272_vm2, %v300_v31, %v301_v32  ;;  %v315_v44 = vrot.slane %v2695_v38, 1  ;;  %v316_v47 = vrot.slane %v2697_v39, 1  ;;  %v322_v58 = vrot.slane %v2337_v5, 2  ;;  %1244 = vst.msk [vmem:[#allocation3] sm:$0xff] %vm802_vm4, %v4474_v0 }
  0x3c   :  { %408 = vrot.lane.b32.xlu1 %v2649_v18, %s2257_s24  ;;  %v2701_v40 = vld [vmem:[#allocation2 + $0xe0] sm:$0xff]  ;;  %v2703_v41 = vld [vmem:[#allocation2 + $0xe8] sm:$0x3]  ;;  %v2716_v50 = vsel %vm272_vm2, %v303_v42, %v304_v43  ;;  %v2748_v27 = vsel %vm321_vm3, %v325_v13, %v326_v14  ;;  %v323_v29 = vrot.slane %v2341_v6, 2  ;;  %v334_v30 = vrot.slane %v2598_v51, 2  ;;  %1247 = vst.msk [vmem:[#allocation3 + $0x10] sm:$0xff] %vm802_vm4, %v4474_v0 }
  0x3d   :  { %412 = vrot.lane.b32.xlu2 %v2653_v19, %s2257_s24  ;;  %v309_v48 = vrot.slane %v2701_v40, 1  ;;  %v310_v49 = vrot.slane %v2703_v41, 1  ;;  %v2719_v53 = vsel %vm272_vm2, %v315_v44, %v316_v47  ;;  %v2721_v54 = vld [vmem:[#allocation2 + $0xf0] sm:$0xff]  ;;  %v2723_v55 = vld [vmem:[#allocation2 + $0xf8] sm:$0x3]  ;;  %v335_v31 = vrot.slane %v2600_v52, 2 }
  0x3e   :  { %414 = vrot.lane.b32.xlu0 %v2660_v22, %s2257_s24  ;;  %v2730_v60 = vld [vmem:[#allocation2 + $0x110] sm:$0xff]  ;;  %v2732_v61 = vld [vmem:[#allocation2 + $0x118] sm:$0x3]  ;;  %v312_v9 = vrot.slane %v2721_v54, 1  ;;  %v313_v10 = vrot.slane %v2723_v55, 1  ;;  %v328_v32 = vrot.slane %v2591_v45, 2  ;;  %v324_v43 = vsel %vm321_vm3, %v322_v58, %v323_v29 }
  0x3f   :  { %v2726_v56 = vsel %vm272_vm2, %v309_v48, %v310_v49  ;;  %v318_v15 = vrot.slane %v2730_v60, 1  ;;  %v319_v16 = vrot.slane %v2732_v61, 1  ;;  %v329_v42 = vrot.slane %v2593_v46, 2  ;;  %1249 = vst.msk [vmem:[#allocation3 + $0x20] sm:$0xff] %vm802_vm4, %v4474_v0 }
  0x40   :  { %v2745_v17 = vsel %vm272_vm2, %v312_v9, %v313_v10  ;;  %v2767_v44 = vsel %vm321_vm3, %v334_v30, %v335_v31  ;;  %v331_v6 = vrot.slane %v2615_v62, 2  ;;  %v332_v52 = vrot.slane %v2617_v63, 2  ;;  %v2140_v30 = vld [vmem:[%s4466_s0 + $0xb8] sm:$0xff]  ;;  %1251 = vst.msk [vmem:[#allocation3 + $0x30] sm:$0xff] %vm802_vm4, %v4474_v0 }
  0x41   :  { %v2751_v28 = vsel %vm272_vm2, %v318_v15, %v319_v16  ;;  %v2770_v5 = vsel %vm321_vm3, %v328_v32, %v329_v42  ;;  %v343_v46 = vrot.slane %v2655_v20, 2  ;;  %v344_v47 = vrot.slane %v2657_v21, 2  ;;  %v2172_v31 = vld [vmem:[%s4466_s0 + $0x1b8] sm:$0xff]  ;;  %1253 = vst.msk [vmem:[#allocation3 + $0x40] sm:$0xff] %vm802_vm4, %v4474_v0 }
  0x42   :  { %v337_v48 = vrot.slane %v2625_v4, 2  ;;  %v338_v49 = vrot.slane %v2627_v7, 2  ;;  %v2784_v9 = vsel %vm321_vm3, %v331_v6, %v332_v52  ;;  %v340_v63 = vrot.slane %v2637_v11, 2  ;;  %1255 = vst.msk [vmem:[#allocation3 + $0x50] sm:$0xff] %vm802_vm4, %v4474_v0 }
  0x43   :  { %v2787_v10 = vsel %vm321_vm3, %v343_v46, %v344_v47  ;;  %v341_v21 = vrot.slane %v2639_v12, 2  ;;  %v352_v7 = vrot.slane %v2688_v35, 2  ;;  %v353_v14 = vrot.slane %v2690_v36, 2  ;;  %v33_v12 = vld [vmem:[%s4466_s0 + $0x38] sm:$0xff]  ;;  %1257 = vst.msk [vmem:[#allocation3 + $0x60] sm:$0xff] %vm802_vm4, %v4474_v0 }
  0x44   :  { %416 = vrot.lane.b32.xlu1 %v2683_v33, %s2257_s24  ;;  %v2790_v13 = vsel %vm321_vm3, %v337_v48, %v338_v49  ;;  %v346_v15 = vrot.slane %v2325_v1, 2  ;;  %v347_v16 = vrot.slane %v2329_v2, 2  ;;  %v2156_v1 = vld [vmem:[%s4466_s0 + $0x138] sm:$0xff]  ;;  %v66_v36 = vmax.f32 %v33_v12, %v2140_v30  ;;  %1259 = vst.msk [vmem:[#allocation3 + $0x70] sm:$0xff] %vm802_vm4, %v4474_v0 }
  0x45   :  { %424 = vrot.lane.b32.xlu2 %v2686_v34, %s2257_s24  ;;  %v2805_v58 = vsel %vm321_vm3, %v340_v63, %v341_v21  ;;  %v2808_v29 = vsel %vm321_vm3, %v352_v7, %v353_v14  ;;  %v116_v32 = vmax.f32 %v2156_v1, %v2172_v31  ;;  %v349_v42 = vrot.slane %v2668_v25, 2  ;;  %1261 = vst.msk [vmem:[#allocation3 + $0x80] sm:$0xff] %vm802_vm4, %v4474_v0 }
  0x46   :  { %420 = vrot.lane.b32.xlu0 %v2693_v37, %s2257_s24  ;;  %v348_v2 = vsel %vm321_vm3, %v346_v15, %v347_v16  ;;  %v361_v6 = vrot.slane %v2721_v54, 2  ;;  %v362_v52 = vrot.slane %v2723_v55, 2  ;;  %v355_v47 = vrot.slane %v2662_v23, 2  ;;  %v41_v15 = vld [vmem:[%s4466_s0 + $0x78] sm:$0xff]  ;;  %1263 = vst.msk [vmem:[#allocation3 + $0x90] sm:$0xff] %vm802_vm4, %v4474_v0 }
  0x47   :  { %v132_v46 = vmax.f32 %v66_v36, %v116_v32  ;;  %v356_v48 = vrot.slane %v2664_v24, 2  ;;  %v358_v55 = vrot.slane %v2701_v40, 2  ;;  %v359_v24 = vrot.slane %v2703_v41, 2  ;;  %v2148_v16 = vld [vmem:[%s4466_s0 + $0xf8] sm:$0xff]  ;;  %1265 = vst.msk [vmem:[#allocation3 + $0xa0] sm:$0xff] %vm802_vm4, %v4474_v0 }
  0x48   :  { %v2839_v63 = vsel %vm321_vm3, %v361_v6, %v362_v52  ;;  %v364_v21 = vrot.slane %v2695_v38, 2  ;;  %v365_v7 = vrot.slane %v2697_v39, 2  ;;  %v2164_v41 = vld [vmem:[%s4466_s0 + $0x178] sm:$0xff]  ;;  %v74_v30 = vmax.f32 %v41_v15, %v2148_v16  ;;  %1267 = vst.msk [vmem:[#allocation3 + $0xb0] sm:$0xff] %vm802_vm4, %v4474_v0 }
  0x49   :  { %191 = vst.msk [vmem:[#allocation2 + $0x81] sm:$0xff] %vm141_vm0, %v132_v46  ;;  %v2855_v14 = vsel %vm321_vm3, %v358_v55, %v359_v24  ;;  %v2180_v39 = vld [vmem:[%s4466_s0 + $0x1f8] sm:$0xff]  ;;  %v368_v36 = vrot.slane %v2732_v61, 2  ;;  %s2260_s0 = smov 16  }
  0x4a   :  { %v2867_v12 = vsel %vm321_vm3, %v364_v21, %v365_v7  ;;  %v124_v1 = vmax.f32 %v2164_v41, %v2180_v39  ;;  %1269 = vst.msk [vmem:[#allocation3 + $0xc0] sm:$0xff] %vm802_vm4, %v4474_v0 }
  0x4b   :  { %1271 = vst.msk [vmem:[#allocation3 + $0xd0] sm:$0xff] %vm802_vm4, %v4474_v0 }
  0x4c   :  { %422 = vrot.lane.b32.xlu1 %v2716_v50, %s2257_s24  ;;  %v140_v31 = vmax.f32 %v74_v30, %v124_v1  ;;  %1273 = vst.msk [vmem:[#allocation3 + $0xe0] sm:$0xff] %vm802_vm4, %v4474_v0 }
  0x4d   :  { %430 = vrot.lane.b32.xlu2 %v2719_v53, %s2257_s24  ;;  %1275 = vst.msk [vmem:[#allocation3 + $0xf0] sm:$0xff] %vm802_vm4, %v4474_v0 }
  0x4e   :  { %426 = vrot.lane.b32.xlu0 %v2726_v56, %s2257_s24  ;;  %199 = vst.msk [vmem:[#allocation2 + $0x121] sm:$0xff] %vm141_vm0, %v140_v31 }
  0x4f   :  { %1277 = vst.msk [vmem:[#allocation3 + $0x100] sm:$0xff] %vm802_vm4, %v4474_v0 }
  0x50   :  { %1279 = vst.msk [vmem:[#allocation3 + $0x110] sm:$0xff] %vm802_vm4, %v4474_v0 }
  0x51   :  { %1281 = vst.msk [vmem:[#allocation3 + $0x120] sm:$0xff] %vm802_vm4, %v4474_v0 }
  0x52   :  { %1283 = vst.msk [vmem:[#allocation3 + $0x130] sm:$0xff] %vm802_vm4, %v4474_v0 }
  0x54   :  { %428 = vrot.lane.b32.xlu1 %v2745_v17, %s2257_s24 }
  0x55   :  { %452 = vrot.lane.b32.xlu2 %v2748_v27, %s2258_s27 }
  0x56   :  { %432 = vrot.lane.b32.xlu0 %v2751_v28, %s2257_s24 }
  0x5c   :  { %450 = vrot.lane.b32.xlu1 %v324_v43, %s2258_s27  ;;  %v350_v43 = vrot.slane %v2670_v26, 2  ;;  %v2842_v26 = vsel %vm321_vm3, %v355_v47, %v356_v48  ;;  %v2956_v47 = vld [vmem:[#allocation2 + $0x120] sm:$0xff] }
  0x5d   :  { %458 = vrot.lane.b32.xlu2 %v2767_v44, %s2258_s27 }
  0x5e   :  { %454 = vrot.lane.b32.xlu0 %v2770_v5, %s2258_s27  ;;  %v2836_v49 = vsel %vm321_vm3, %v349_v42, %v350_v43  ;;  %v2906_v43 = vld [vmem:[#allocation2 + $0x80] sm:$0xff] }
  0x5f   :  { %v374_v39 = vrot.slane %v2906_v43, 1 }
  0x64   :  { %456 = vrot.lane.b32.xlu1 %v2784_v9, %s2258_s27 }
  0x65   :  { %464 = vrot.lane.b32.xlu2 %v2787_v10, %s2258_s27 }
  0x66   :  { %460 = vrot.lane.b32.xlu0 %v2790_v13, %s2258_s27 }
  0x67   :  { %v2888_v42 = vpop.permute.xlu2 %418 }
  0x6c   :  { %462 = vrot.lane.b32.xlu1 %v2805_v58, %s2258_s27 }
  0x6d   :  { %470 = vrot.lane.b32.xlu2 %v2808_v29, %s2258_s27 }
  0x6e   :  { %466 = vrot.lane.b32.xlu0 %v348_v2, %s2258_s27  ;;  %v367_v2 = vrot.slane %v2730_v60, 2 }
  0x70   :  { %v2882_v32 = vsel %vm321_vm3, %v367_v2, %v368_v36 }
  0x74   :  { %468 = vrot.lane.b32.xlu1 %v2836_v49, %s2258_s27 }
  0x75   :  { %476 = vrot.lane.b32.xlu2 %v2839_v63, %s2258_s27 }
  0x76   :  { %472 = vrot.lane.b32.xlu0 %v2842_v26, %s2258_s27 }
  0x7c   :  { %474 = vrot.lane.b32.xlu1 %v2855_v14, %s2258_s27 }
  0x7d   :  { %498 = vrot.lane.b32.xlu2 %v2605_v57, %s2259_s20 }
  0x7e   :  { %478 = vrot.lane.b32.xlu0 %v2867_v12, %s2258_s27 }
  0x81   :  { %v2944_v52 = vpop.permute.xlu0 %402 }
  0x84   :  { %480 = vrot.lane.b32.xlu1 %v2882_v32, %s2258_s27 }
  0x85   :  { %504 = vrot.lane.b32.xlu2 %v2598_v51, %s2259_s20 }
  0x86   :  { %500 = vrot.lane.b32.xlu0 %v2591_v45, %s2259_s20 }
  0x8c   :  { %502 = vrot.lane.b32.xlu1 %v2615_v62, %s2259_s20 }
  0x8d   :  { %510 = vrot.lane.b32.xlu2 %v2655_v20, %s2259_s20 }
  0x8e   :  { %506 = vrot.lane.b32.xlu0 %v2625_v4, %s2259_s20 }
  0x8f   :  { %v2898_v61 = vpop.permute.xlu2 %410 }
  0x90   :  { %4483 = vst [vmem:[#allocation6_spill] sm:$0xff] %v2898_v61 }
  0x94   :  { %508 = vrot.lane.b32.xlu1 %v2637_v11, %s2259_s20 }
  0x95   :  { %516 = vrot.lane.b32.xlu2 %v2688_v35, %s2259_s20 }
  0x96   :  { %512 = vrot.lane.b32.xlu0 %v2906_v43, %s2259_s20 }
  0x97   :  { %v2922_v6 = vpop.permute.xlu2 %412 }
  0x98   :  { %4484 = vst [vmem:[#allocation7_spill] sm:$0xff] %v2922_v6  ;;  %v3028_v6 = vld [vmem:[#allocation2 + $0x128] sm:$0x3] }
  0x9c   :  { %514 = vrot.lane.b32.xlu1 %v2668_v25, %s2259_s20 }
  0x9d   :  { %522 = vrot.lane.b32.xlu2 %v2721_v54, %s2259_s20 }
  0x9e   :  { %518 = vrot.lane.b32.xlu0 %v2662_v23, %s2259_s20 }
  0x9f   :  { %v2948_v46 = vpop.permute.xlu2 %424 }
  0xa0   :  { %4485 = vst [vmem:[#allocation8_spill] sm:$0xff] %v2948_v46 }
  0xa4   :  { %520 = vrot.lane.b32.xlu1 %v2701_v40, %s2259_s20 }
  0xa5   :  { %528 = vrot.lane.b32.xlu2 %v2956_v47, %s2259_s20 }
  0xa6   :  { %v2966_v48 = vpop.permute.xlu1 %406  ;;  %524 = vrot.lane.b32.xlu0 %v2695_v38, %s2259_s20 }
  0xa7   :  { %v2970_v55 = vpop.permute.xlu2 %430 }
  0xa8   :  { %4486 = vst [vmem:[#allocation9_spill] sm:$0xff] %v2970_v55  ;;  %v2972_v24 = vpop.permute.xlu0 %404 }
  0xac   :  { %526 = vrot.lane.b32.xlu1 %v2730_v60, %s2259_s20 }
  0xad   :  { %550 = vrot.lane.b32.xlu2 %v2649_v18, %s2260_s0 }
  0xae   :  { %v2978_v21 = vpop.permute.xlu1 %408  ;;  %546 = vrot.lane.b32.xlu0 %v2633_v8, %s2260_s0  ;;  %v2998_v8 = vld [vmem:[#allocation2 + $0x88] sm:$0x3] }
  0xaf   :  { %4487 = vst [vmem:[#allocation10_spill] sm:$0xff] %v2978_v21  ;;  %v2982_v7 = vpop.permute.xlu2 %452  ;;  %v375_v1 = vrot.slane %v2998_v8, 1 }
  0xb0   :  { %v2984_v15 = vpop.permute.xlu0 %414 }
  0xb1   :  { %v376_v0 = vsel %vm272_vm2, %v374_v39, %v375_v1 }
  0xb4   :  { %548 = vrot.lane.b32.xlu1 %v2611_v59, %s2260_s0 }
  0xb5   :  { %556 = vrot.lane.b32.xlu2 %v2660_v22, %s2260_s0 }
  0xb6   :  { %v2990_v16 = vpop.permute.xlu1 %416  ;;  %552 = vrot.lane.b32.xlu0 %v2623_v3, %s2260_s0 }
  0xb7   :  { %v2994_v41 = vpop.permute.xlu2 %458 }
  0xb8   :  { %4488 = vst [vmem:[#allocation11_spill] sm:$0xff] %v2994_v41  ;;  %v2996_v30 = vpop.permute.xlu0 %420 }
  0xb9   :  { %4489 = vst [vmem:[#allocation12_spill] sm:$0xff] %v2996_v30 }
  0xbc   :  { %554 = vrot.lane.b32.xlu1 %v2653_v19, %s2260_s0 }
  0xbd   :  { %562 = vrot.lane.b32.xlu2 %v2693_v37, %s2260_s0 }
  0xbe   :  { %v3006_v2 = vpop.permute.xlu1 %422  ;;  %558 = vrot.lane.b32.xlu0 %v2683_v33, %s2260_s0 }
  0xbf   :  { %4490 = vst [vmem:[#allocation13_spill] sm:$0xff] %v3006_v2  ;;  %v3010_v36 = vpop.permute.xlu2 %464  ;;  %v377_v2 = vrot.slane %v2956_v47, 1 }
  0xc0   :  { %v3012_v31 = vpop.permute.xlu0 %426 }
  0xc1   :  { %4491 = vst [vmem:[#allocation14_spill] sm:$0xff] %v3012_v31 }
  0xc4   :  { %560 = vrot.lane.b32.xlu1 %v376_v0, %s2260_s0 }
  0xc5   :  { %568 = vrot.lane.b32.xlu2 %v2726_v56, %s2260_s0 }
  0xc6   :  { %v3018_v37 = vpop.permute.xlu1 %428  ;;  %564 = vrot.lane.b32.xlu0 %v2716_v50, %s2260_s0 }
  0xc7   :  { %4492 = vst [vmem:[#allocation15_spill] sm:$0xff] %v3018_v37  ;;  %v3022_v55 = vpop.permute.xlu2 %470 }
  0xc8   :  { %4493 = vst [vmem:[#allocation16_spill] sm:$0xff] %v3022_v55  ;;  %v3024_v46 = vpop.permute.xlu0 %432  ;;  %v378_v55 = vrot.slane %v3028_v6, 1 }
  0xc9   :  { %4494 = vst [vmem:[#allocation17_spill] sm:$0xff] %v3024_v46 }
  0xca   :  { %v3043_v37 = vsel %vm272_vm2, %v377_v2, %v378_v55 }
  0xcc   :  { %566 = vrot.lane.b32.xlu1 %v2686_v34, %s2260_s0 }
  0xcd   :  { %574 = vrot.lane.b32.xlu2 %v2751_v28, %s2260_s0 }
  0xce   :  { %v3032_v39 = vpop.permute.xlu1 %450  ;;  %570 = vrot.lane.b32.xlu0 %v2745_v17, %s2260_s0 }
  0xcf   :  { %v3036_v1 = vpop.permute.xlu2 %476 }
  0xd0   :  { %4495 = vst [vmem:[#allocation18_spill] sm:$0xff] %v3036_v1  ;;  %v3040_v46 = vpop.permute.xlu0 %454 }
  0xd4   :  { %572 = vrot.lane.b32.xlu1 %v2719_v53, %s2260_s0 }
  0xd5   :  { %596 = vrot.lane.b32.xlu2 %v2770_v5, %s2261_s21 }
  0xd6   :  { %v3049_v41 = vpop.permute.xlu1 %456  ;;  %576 = vrot.lane.b32.xlu0 %v3043_v37, %s2260_s0 }
  0xd7   :  { %4496 = vst [vmem:[#allocation19_spill] sm:$0xff] %v3049_v41  ;;  %v3053_v1 = vpop.permute.xlu2 %498  ;;  %v219_v41 = vld [vmem:[#allocation2 + $0x98] sm:$0x3] }
  0xd8   :  { %v3055_v61 = vpop.permute.xlu0 %460 }
  0xd9   :  { %4497 = vst [vmem:[#allocation20_spill] sm:$0xff] %v3055_v61 }
  0xdc   :  { %594 = vrot.lane.b32.xlu1 %v2748_v27, %s2261_s21 }
  0xdd   :  { %602 = vrot.lane.b32.xlu2 %v2790_v13, %s2261_s21 }
  0xde   :  { %v3061_v55 = vpop.permute.xlu1 %462  ;;  %598 = vrot.lane.b32.xlu0 %v2784_v9, %s2261_s21 }
  0xdf   :  { %v3065_v2 = vpop.permute.xlu2 %504 }
  0xe0   :  { %4498 = vst [vmem:[#allocation21_spill] sm:$0xff] %v3065_v2  ;;  %v3067_v25 = vpop.permute.xlu0 %466  ;;  %v218_v2 = vld [vmem:[#allocation2 + $0x90] sm:$0xff] }
  0xe1   :  { %4499 = vst [vmem:[#allocation22_spill] sm:$0xff] %v3067_v25 }
  0xe4   :  { %600 = vrot.lane.b32.xlu1 %v2767_v44, %s2261_s21 }
  0xe5   :  { %738 = vrot.lane.b32.xlu2 %v2770_v5, %s2262_s22 }
  0xe6   :  { %v3073_v27 = vpop.permute.xlu1 %468  ;;  %642 = vrot.lane.b32.xlu0 %v2591_v45, %s2263_s23 }
  0xe7   :  { %4500 = vst [vmem:[#allocation23_spill] sm:$0xff] %v3073_v27  ;;  %v3077_v61 = vpop.permute.xlu2 %510 }
  0xe8   :  { %v3079_v30 = vpop.permute.xlu0 %472 }
  0xe9   :  { %4501 = vst [vmem:[#allocation24_spill] sm:$0xff] %v3079_v30  ;;  %v380_v30 = vrot.slane %v2906_v43, 2 }
  0xec   :  { %690 = vrot.lane.b32.xlu1 %v2611_v59, %s2264_s25  ;;  %v381_v59 = vrot.slane %v2998_v8, 2  ;;  %v397_v8 = vrot.slane %v219_v41, 2 }
  0xed   :  { %702 = vrot.lane.b32.xlu2 %v376_v0, %s2264_s25 }
  0xee   :  { %v3084_v31 = vpop.permute.xlu1 %474  ;;  %606 = vrot.lane.b32.xlu0 %v2787_v10, %s2261_s21 }
  0xef   :  { %4502 = vst [vmem:[#allocation25_spill] sm:$0xff] %v3084_v31  ;;  %v3088_v5 = vpop.permute.xlu2 %516 }
  0xf0   :  { %4503 = vst [vmem:[#allocation26_spill] sm:$0xff] %v3088_v5  ;;  %v3090_v27 = vpop.permute.xlu0 %478 }
  0xf1   :  { %4504 = vst [vmem:[#allocation27_spill] sm:$0xff] %v3090_v27  ;;  %v382_v27 = vsel %vm321_vm3, %v380_v30, %v381_v59 }
  0xf4   :  { %654 = vrot.lane.b32.xlu1 %v2906_v43, %s2263_s23  ;;  %v396_v43 = vrot.slane %v218_v2, 2 }
  0xf5   :  { %692 = vrot.lane.b32.xlu2 %v2649_v18, %s2264_s25 }
  0xf6   :  { %v3098_v0 = vpop.permute.xlu1 %480  ;;  %644 = vrot.lane.b32.xlu0 %v2615_v62, %s2263_s23  ;;  %v398_v30 = vsel %vm321_vm3, %v396_v43, %v397_v8 }
  0xf7   :  { %4505 = vst [vmem:[#allocation28_spill] sm:$0xff] %v3098_v0  ;;  %v3102_v31 = vpop.permute.xlu2 %522  ;;  %v390_v0 = vrot.slane %v218_v2, 1 }
  0xf8   :  { %4506 = vst [vmem:[#allocation29_spill] sm:$0xff] %v3102_v31  ;;  %v3104_v5 = vpop.permute.xlu0 %500  ;;  %v391_v31 = vrot.slane %v219_v41, 1 }
  0xfa   :  { %v392_v59 = vsel %vm272_vm2, %v390_v0, %v391_v31 }
  0xfc   :  { %750 = vrot.lane.b32.xlu1 %v382_v27, %s2262_s22 }
  0xfd   :  { %656 = vrot.lane.b32.xlu2 %v218_v2, %s2263_s23 }
  0xfe   :  { %v3109_v18 = vpop.permute.xlu1 %502  ;;  %740 = vrot.lane.b32.xlu0 %v2784_v9, %s2262_s22 }
  0xff   :  { %v3113_v62 = vpop.permute.xlu2 %528 }
 0x100   :  { %4507 = vst [vmem:[#allocation30_spill] sm:$0xff] %v3113_v62  ;;  %v3115_v21 = vpop.permute.xlu0 %506  ;;  %v922_v62 = vld [vmem:[%s4467_s1 + $0x8] sm:$0xff] }
 0x104   :  { %608 = vrot.lane.b32.xlu1 %v382_v27, %s2261_s21 }
 0x105   :  { %752 = vrot.lane.b32.xlu2 %v398_v30, %s2262_s22 }
 0x106   :  { %v3121_v25 = vpop.permute.xlu1 %508  ;;  %704 = vrot.lane.b32.xlu0 %v392_v59, %s2264_s25  ;;  %v923_v59 = vld [vmem:[%s4467_s1 + $0x10] sm:$0xff] }
 0x107   :  { %4508 = vst [vmem:[#allocation31_spill] sm:$0xff] %v3121_v25  ;;  %v3124_v9 = vpop.permute.xlu2 %550 }
 0x108   :  { %v3126_v2 = vpop.permute.xlu0 %512 }
 0x10c   :  { %646 = vrot.lane.b32.xlu1 %v2598_v51, %s2263_s23 }
 0x10d   :  { %610 = vrot.lane.b32.xlu2 %v2836_v49, %s2261_s21 }
 0x10e   :  { %v3132_v41 = vpop.permute.xlu1 %514  ;;  %694 = vrot.lane.b32.xlu0 %v2623_v3, %s2264_s25 }
 0x10f   :  { %v3136_v31 = vpop.permute.xlu2 %556 }
 0x110   :  { %4509 = vst [vmem:[#allocation32_spill] sm:$0xff] %v3136_v31  ;;  %v3138_v27 = vpop.permute.xlu0 %518 }
 0x114   :  { %742 = vrot.lane.b32.xlu1 %v2767_v44, %s2262_s22 }
 0x115   :  { %648 = vrot.lane.b32.xlu2 %v2625_v4, %s2263_s23 }
 0x116   :  { %v3144_v0 = vpop.permute.xlu1 %520  ;;  %658 = vrot.lane.b32.xlu0 %v2688_v35, %s2263_s23 }
 0x117   :  { %4510 = vst [vmem:[#allocation33_spill] sm:$0xff] %v3144_v0  ;;  %v3148_v51 = vpop.permute.xlu2 %562 }
 0x118   :  { %v3150_v49 = vpop.permute.xlu0 %524 }
 0x11c   :  { %706 = vrot.lane.b32.xlu1 %v2716_v50, %s2264_s25 }
 0x11d   :  { %744 = vrot.lane.b32.xlu2 %v2790_v13, %s2262_s22 }
 0x11e   :  { %v3156_v3 = vpop.permute.xlu1 %526  ;;  %754 = vrot.lane.b32.xlu0 %v2808_v29, %s2262_s22 }
 0x11f   :  { %4511 = vst [vmem:[#allocation34_spill] sm:$0xff] %v3156_v3  ;;  %v3160_v4 = vpop.permute.xlu2 %568 }
 0x120   :  { %4512 = vst [vmem:[#allocation35_spill] sm:$0xff] %v3160_v4  ;;  %v3162_v44 = vpop.permute.xlu0 %546 }
 0x124   :  { %696 = vrot.lane.b32.xlu1 %v2653_v19, %s2264_s25 }
 0x125   :  { %660 = vrot.lane.b32.xlu2 %v2662_v23, %s2263_s23 }
 0x126   :  { %v3168_v43 = vpop.permute.xlu1 %548  ;;  %612 = vrot.lane.b32.xlu0 %v2808_v29, %s2261_s21 }
 0x127   :  { %v3172_v50 = vpop.permute.xlu2 %574 }
 0x128   :  { %4513 = vst [vmem:[#allocation36_spill] sm:$0xff] %v3172_v50  ;;  %v3174_v13 = vpop.permute.xlu0 %552 }
 0x12c   :  { %618 = vrot.lane.b32.xlu1 %v2839_v63, %s2261_s21 }
 0x12d   :  { %714 = vrot.lane.b32.xlu2 %v2719_v53, %s2264_s25 }
 0x12e   :  { %v3180_v8 = vpop.permute.xlu1 %554  ;;  %666 = vrot.lane.b32.xlu0 %v2695_v38, %s2263_s23  ;;  %v925_v38 = vld [vmem:[%s4467_s1 + $0x20] sm:$0xf] }
 0x12f   :  { %v3184_v19 = vpop.permute.xlu2 %596  ;;  %2181 = vmatpush.msk.msra.mxu0 %vm975_vm5, %v925_v38  ;;  %2215 = vmatpush.msk.msra.mxu2 %vm975_vm5, %v925_v38 }
 0x130   :  { %v3186_v23 = vpop.permute.xlu0 %558  ;;  %2216 = vmatpush.msk.msra.mxu3 %vm975_vm5, %v925_v38  ;;  %vm1950_vm5 = vcmask 326656  }
 0x134   :  { %708 = vrot.lane.b32.xlu1 %v2686_v34, %s2264_s25  ;;  %v924_v34 = vld [vmem:[%s4467_s1 + $0x18] sm:$0xff] }
 0x135   :  { %762 = vrot.lane.b32.xlu2 %v2867_v12, %s2262_s22  ;;  %991 = vmatpush.msra.mxu0 %v924_v34 }
 0x136   :  { %v3192_v29 = vpop.permute.xlu1 %560  ;;  %650 = vrot.lane.b32.xlu0 %v2637_v11, %s2263_s23  ;;  %2217 = vmatpush.msra.mxu2 %v924_v34 }
 0x137   :  { %v3196_v53 = vpop.permute.xlu2 %602  ;;  %2218 = vmatpush.msra.mxu3 %v924_v34  ;;  %992 = vmatpush.msra.mxu0 %v923_v59  ;;  %v921_v34 = vld [vmem:[%s4467_s1] sm:$0xff] }
 0x138   :  { %v3201_v30 = vpop.permute.xlu0 %564  ;;  %2219 = vmatpush.msra.mxu2 %v923_v59 }
 0x139   :  { %993 = vmatpush.msra.mxu0 %v922_v62  ;;  %2220 = vmatpush.msra.mxu3 %v923_v59 }
 0x13a   :  { %2221 = vmatpush.msra.mxu2 %v922_v62 }
 0x13b   :  { %994 = vmatpush.msra.mxu0 %v921_v34  ;;  %2222 = vmatpush.msra.mxu3 %v922_v62 }
 0x13c   :  { %756 = vrot.lane.b32.xlu1 %v2842_v26, %s2262_s22  ;;  %2223 = vmatpush.msra.mxu2 %v921_v34 }
 0x13d   :  { %614 = vrot.lane.b32.xlu2 %v2842_v26, %s2261_s21  ;;  %2224 = vmatpush.msra.mxu3 %v921_v34 }
 0x13e   :  { %v3216_v50 = vpop.permute.xlu1 %566  ;;  %698 = vrot.lane.b32.xlu0 %v2660_v22, %s2264_s25 }
 0x13f   :  { %v739_v38 = vpop.permute.xlu2 %738 }
 0x140   :  { %v3223_v3 = vpop.permute.xlu0 %570 }
 0x144   :  { %746 = vrot.lane.b32.xlu1 %v2805_v58, %s2262_s22 }
 0x145   :  { %668 = vrot.lane.b32.xlu2 %v2730_v60, %s2263_s23 }
 0x146   :  { %v3229_v22 = vpop.permute.xlu1 %572  ;;  %620 = vrot.lane.b32.xlu0 %v2867_v12, %s2261_s21 }
 0x147   :  { %v703_v26 = vpop.permute.xlu2 %702 }
 0x148   :  { %v3233_v4 = vpop.permute.xlu0 %576 }
 0x149   :  { %4514 = vst [vmem:[#allocation37_spill] sm:$0xff] %v3233_v4  ;;  %v2249_v4 = vld [vmem:[#allocation2] sm:$0xff] }
 0x14c   :  { %662 = vrot.lane.b32.xlu1 %v2701_v40, %s2263_s23 }
 0x14d   :  { %716 = vrot.lane.b32.xlu2 %v2751_v28, %s2264_s25 }
 0x14e   :  { %v595_v62 = vpop.permute.xlu1 %594  ;;  %604 = vrot.lane.b32.xlu0 %v2805_v58, %s2261_s21  ;;  %v786_v58 = vsel %vm141_vm0, %v2249_v4, %v2944_v52 }
 0x14f   :  { %v693_v59 = vpop.permute.xlu2 %692  ;;  %v803_v0 = vsel %vm802_vm4, %v786_v58, %v3032_v39  ;;  %v384_v58 = vrot.slane %v3028_v6, 2  ;;  %v238_v6 = vld [vmem:[#allocation2 + $0x130] sm:$0xff] }
 0x150   :  { %v3241_v60 = vpop.permute.xlu0 %598 }
 0x154   :  { %710 = vrot.lane.b32.xlu1 %v2726_v56, %s2264_s25  ;;  %v820_v56 = vsel %vm819_vm6, %v803_v0, %v3053_v1 }
 0x155   :  { %764 = vrot.lane.b32.xlu2 %v2882_v32, %s2262_s22  ;;  %v837_v31 = vsel %vm836_vm7, %v820_v56, %v3162_v44 }
 0x156   :  { %v3247_v12 = vpop.permute.xlu1 %600  ;;  %652 = vrot.lane.b32.xlu0 %v2655_v20, %s2263_s23  ;;  %v854_v25 = vsel %vm853_vm9, %v837_v31, %v595_v62 }
 0x157   :  { %v3251_v34 = vpop.permute.xlu2 %656 }
 0x158   :  { %v643_v28 = vpop.permute.xlu0 %642 }
 0x159   :  { %v871_v52 = vsel %vm870_vm8, %v854_v25, %v643_v28  ;;  %v792_v25 = vsel %vm141_vm0, %v2637_v11, %v2984_v15 }
 0x15c   :  { %758 = vrot.lane.b32.xlu1 %v2855_v14, %s2262_s22 }
 0x15d   :  { %616 = vrot.lane.b32.xlu2 %v2855_v14, %s2261_s21  ;;  %v809_v14 = vsel %vm802_vm4, %v792_v25, %v3061_v55 }
 0x15e   :  { %v691_v39 = vpop.permute.xlu1 %690  ;;  %700 = vrot.lane.b32.xlu0 %v2683_v33, %s2264_s25 }
 0x15f   :  { %v888_v1 = vsel %vm887_vm10, %v871_v52, %v691_v39  ;;  %v753_v0 = vpop.permute.xlu2 %752  ;;  %v239_v39 = vld [vmem:[#allocation2 + $0x138] sm:$0x3] }
 0x160   :  { %v905_v4 = vsel %vm904_vm11, %v888_v1, %v739_v38  ;;  %v607_v44 = vpop.permute.xlu0 %606  ;;  %v826_v38 = vsel %vm819_vm6, %v809_v14, %v3077_v61  ;;  %v399_v14 = vrot.slane %v238_v6, 2 }
 0x161   :  { %2182 = vmatmul.msk.f32.vlgmr.msra.gmra.mxu0 %vm926_vm12, %v905_v4  ;;  %v843_v15 = vsel %vm836_vm7, %v826_v38, %v3186_v23 }
 0x162   :  { %v860_v55 = vsel %vm853_vm9, %v843_v15, %v607_v44  ;;  %v394_v44 = vrot.slane %v239_v39, 1 }
 0x164   :  { %748 = vrot.lane.b32.xlu1 %v2787_v10, %s2262_s22  ;;  %v787_v10 = vsel %vm141_vm0, %v2605_v57, %v2972_v24 }
 0x165   :  { %670 = vrot.lane.b32.xlu2 %v2956_v47, %s2263_s23  ;;  %v804_v11 = vsel %vm802_vm4, %v787_v10, %v2982_v7  ;;  %v400_v10 = vrot.slane %v239_v39, 2 }
 0x166   :  { %v655_v33 = vpop.permute.xlu1 %654  ;;  %622 = vrot.lane.b32.xlu0 %v2882_v32, %s2261_s21  ;;  %v821_v32 = vsel %vm819_vm6, %v804_v11, %v3104_v5 }
 0x167   :  { %v3283_v31 = vpop.permute.xlu2 %610  ;;  %v838_v28 = vsel %vm836_vm7, %v821_v32, %v3168_v43  ;;  %v877_v57 = vsel %vm870_vm8, %v860_v55, %v655_v33  ;;  %v401_v15 = vsel %vm321_vm3, %v399_v14, %v400_v10 }
 0x168   :  { %v645_v62 = vpop.permute.xlu0 %644  ;;  %v855_v61 = vsel %vm853_vm9, %v838_v28, %v3184_v19  ;;  %v894_v5 = vsel %vm887_vm10, %v877_v57, %v703_v26  ;;  %v383_v19 = vrot.slane %v2956_v47, 2 }
 0x169   :  { %v872_v24 = vsel %vm870_vm8, %v855_v61, %v645_v62 }
 0x16a   :  { %v889_v52 = vsel %vm887_vm10, %v872_v24, %v693_v59  ;;  %v385_v26 = vsel %vm321_vm3, %v383_v19, %v384_v58 }
 0x16c   :  { %664 = vrot.lane.b32.xlu1 %v2721_v54, %s2263_s23 }
 0x16d   :  { %760 = vrot.lane.b32.xlu2 %v2839_v63, %s2262_s22 }
 0x16e   :  { %v751_v7 = vpop.permute.xlu1 %750  ;;  %712 = vrot.lane.b32.xlu0 %v2745_v17, %s2264_s25  ;;  %v793_v17 = vsel %vm141_vm0, %v2655_v20, %v2990_v16 }
 0x16f   :  { %v911_v43 = vsel %vm904_vm11, %v894_v5, %v751_v7  ;;  %v3311_v23 = vpop.permute.xlu2 %648  ;;  %v810_v47 = vsel %vm802_vm4, %v793_v17, %v3010_v36  ;;  %v393_v36 = vrot.slane %v238_v6, 1  ;;  %v4515_v7 = vld [vmem:[#allocation22_spill] sm:$0xff] }
 0x170   :  { %2188 = vmatmul.msk.f32.vlgmr.msra.gmra.mxu2 %vm926_vm12, %v911_v43  ;;  %v741_v56 = vpop.permute.xlu0 %740  ;;  %v827_v59 = vsel %vm819_vm6, %v810_v47, %v3126_v2  ;;  %v4516_v17 = vld [vmem:[#allocation10_spill] sm:$0xff] }
 0x171   :  { %v906_v63 = vsel %vm904_vm11, %v889_v52, %v741_v56  ;;  %v844_v1 = vsel %vm836_vm7, %v827_v59, %v3192_v29  ;;  %v395_v29 = vsel %vm272_vm2, %v393_v36, %v394_v44 }
 0x172   :  { %2183 = vmatmul.msk.f32.gmra.mxu0 %vm926_vm12, %v906_v63 }
 0x174   :  { %718 = vrot.lane.b32.xlu1 %v3043_v37, %s2264_s25 }
 0x175   :  { %672 = vrot.lane.b32.xlu2 %v238_v6, %s2263_s23  ;;  %v4518_v6 = vld [vmem:[#allocation19_spill] sm:$0xff] }
 0x176   :  { %v609_v4 = vpop.permute.xlu1 %608  ;;  %766 = vrot.lane.b32.xlu0 %v385_v26, %s2262_s22 }
 0x177   :  { %v861_v20 = vsel %vm853_vm9, %v844_v1, %v609_v4  ;;  %v745_v16 = vpop.permute.xlu2 %744 }
 0x178   :  { %v878_v37 = vsel %vm870_vm8, %v861_v20, %v3251_v34  ;;  %v705_v25 = vpop.permute.xlu0 %704  ;;  %v788_v34 = vsel %vm141_vm0, %v2591_v45, %v2966_v48 }
 0x179   :  { %v895_v33 = vsel %vm887_vm10, %v878_v37, %v705_v25  ;;  %v4520_v25 = vld [vmem:[#allocation14_spill] sm:$0xff] }
 0x17a   :  { %v912_v2 = vsel %vm904_vm11, %v895_v33, %v753_v0  ;;  %v805_v0 = vsel %vm802_vm4, %v788_v34, %v3040_v46  ;;  %v798_v33 = vsel %vm141_vm0, %v2701_v40, %v4520_v25 }
 0x17b   :  { %2189 = vmatmul.msk.f32.gmra.mxu2 %vm926_vm12, %v912_v2  ;;  %v822_v32 = vsel %vm819_vm6, %v805_v0, %v3109_v18  ;;  %v2250_v18 = vld [vmem:[#allocation2 + $0xa0] sm:$0xff]  ;;  %v4521_v2 = vld [vmem:[#allocation25_spill] sm:$0xff] }
 0x17c   :  { %624 = vrot.lane.b32.xlu1 %v385_v26, %s2261_s21  ;;  %v839_v55 = vsel %vm836_vm7, %v822_v32, %v3124_v9  ;;  %v794_v9 = vsel %vm141_vm0, %v2250_v18, %v2888_v42  ;;  %v4517_v42 = vld [vmem:[#allocation4_spill] sm:$0xff] }
 0x17d   :  { %v856_v28 = vsel %vm853_vm9, %v839_v55, %v3241_v60  ;;  %v811_v60 = vsel %vm802_vm4, %v794_v9, %v4515_v7  ;;  %v789_v26 = vsel %vm141_vm0, %v4517_v42, %v4516_v17  ;;  %v4523_v0 = vld [vmem:[#allocation12_spill] sm:$0xff]  ;;  %v4529_v42 = vld [vmem:[#allocation15_spill] sm:$0xff] }
 0x17e   :  { %v647_v38 = vpop.permute.xlu1 %646  ;;  %720 = vrot.lane.b32.xlu0 %v395_v29, %s2264_s25  ;;  %v828_v5 = vsel %vm819_vm6, %v811_v60, %v3132_v41  ;;  %v806_v41 = vsel %vm802_vm4, %v789_v26, %v4518_v6  ;;  %v799_v26 = vsel %vm141_vm0, %v2721_v54, %v4529_v42  ;;  %v4530_v6 = vld [vmem:[#allocation18_spill] sm:$0xff] }
 0x17f   :  { %v661_v62 = vpop.permute.xlu2 %660  ;;  %v873_v57 = vsel %vm870_vm8, %v856_v28, %v647_v38  ;;  %v845_v43 = vsel %vm836_vm7, %v828_v5, %v3148_v51  ;;  %v4519_v51 = vld [vmem:[#allocation21_spill] sm:$0xff]  ;;  %v4525_v28 = vld [vmem:[#allocation23_spill] sm:$0xff]  ;;  %v2251_v5 = vld [vmem:[#allocation2 + $0x40] sm:$0xff] }
 0x180   :  { %v695_v11 = vpop.permute.xlu0 %694  ;;  %v862_v19 = vsel %vm853_vm9, %v845_v43, %v3283_v31  ;;  %v823_v31 = vsel %vm819_vm6, %v806_v41, %v4519_v51  ;;  %v4527_v43 = vld [vmem:[#allocation6_spill] sm:$0xff]  ;;  %v816_v41 = vsel %vm802_vm4, %v799_v26, %v4530_v6 }
 0x181   :  { %v890_v45 = vsel %vm887_vm10, %v873_v57, %v695_v11  ;;  %v840_v59 = vsel %vm836_vm7, %v823_v31, %v3174_v13  ;;  %v815_v13 = vsel %vm802_vm4, %v798_v33, %v4521_v2  ;;  %v4532_v33 = vld [vmem:[#allocation16_spill] sm:$0xff] }
 0x182   :  { %v857_v1 = vsel %vm853_vm9, %v840_v59, %v3247_v12  ;;  %v4522_v12 = vld [vmem:[#allocation29_spill] sm:$0xff] }
 0x183   :  { %v874_v4 = vsel %vm870_vm8, %v857_v1, %v3311_v23  ;;  %v832_v14 = vsel %vm819_vm6, %v815_v13, %v4522_v12 }
 0x184   :  { %768 = vrot.lane.b32.xlu1 %v401_v15, %s2262_s22  ;;  %v849_v10 = vsel %vm836_vm7, %v832_v14, %v3223_v3  ;;  %v4524_v15 = vld [vmem:[#allocation5_spill] sm:$0xff] }
 0x185   :  { %v795_v32 = vsel %vm141_vm0, %v4524_v15, %v4523_v0  ;;  %v4534_v0 = vld [vmem:[#allocation20_spill] sm:$0xff]  ;;  %v4535_v15 = vld [vmem:[#allocation31_spill] sm:$0xff] }
 0x186   :  { %v743_v48 = vpop.permute.xlu1 %742  ;;  %v812_v57 = vsel %vm802_vm4, %v795_v32, %v4525_v28  ;;  %v4536_v32 = vld [vmem:[#allocation32_spill] sm:$0xff] }
 0x187   :  { %v907_v46 = vsel %vm904_vm11, %v890_v45, %v743_v48  ;;  %v715_v24 = vpop.permute.xlu2 %714  ;;  %v4526_v45 = vld [vmem:[#allocation26_spill] sm:$0xff] }
 0x188   :  { %2184 = vmatmul.msk.f32.gmra.mxu0 %vm926_vm12, %v907_v46  ;;  %v659_v61 = vpop.permute.xlu0 %658  ;;  %v829_v48 = vsel %vm819_vm6, %v812_v57, %v4526_v45 }
 0x189   :  { %v879_v56 = vsel %vm870_vm8, %v862_v19, %v659_v61  ;;  %v846_v61 = vsel %vm836_vm7, %v829_v48, %v3201_v30  ;;  %v790_v19 = vsel %vm141_vm0, %v2251_v5, %v4527_v43  ;;  %v4539_v5 = vld [vmem:[#allocation33_spill] sm:$0xff] }
 0x18e   :  { %v707_v58 = vpop.permute.xlu1 %706 }
 0x18f   :  { %v896_v52 = vsel %vm887_vm10, %v879_v56, %v707_v58  ;;  %v763_v39 = vpop.permute.xlu2 %762  ;;  %v4528_v56 = vld [vmem:[#allocation11_spill] sm:$0xff] }
 0x190   :  { %v755_v63 = vpop.permute.xlu0 %754 }
 0x191   :  { %v913_v47 = vsel %vm904_vm11, %v896_v52, %v755_v63  ;;  %v807_v52 = vsel %vm802_vm4, %v790_v19, %v4528_v56  ;;  %v4540_v19 = vld [vmem:[#allocation35_spill] sm:$0xff] }
 0x192   :  { %2190 = vmatmul.msk.f32.gmra.mxu2 %vm926_vm12, %v913_v47  ;;  %v824_v63 = vsel %vm819_vm6, %v807_v52, %v3115_v21  ;;  %v833_v21 = vsel %vm819_vm6, %v816_v41, %v3150_v49 }
 0x196   :  { %v697_v20 = vpop.permute.xlu1 %696 }
 0x197   :  { %v891_v36 = vsel %vm887_vm10, %v874_v4, %v697_v20  ;;  %v615_v29 = vpop.permute.xlu2 %614 }
 0x198   :  { %v908_v44 = vsel %vm904_vm11, %v891_v36, %v745_v16  ;;  %v613_v37 = vpop.permute.xlu0 %612 }
 0x199   :  { %2185 = vmatmul.msk.f32.gmra.mxu0 %vm926_vm12, %v908_v44 }
 0x19e   :  { %v619_v23 = vpop.permute.xlu1 %618 }
 0x19f   :  { %v866_v16 = vsel %vm853_vm9, %v849_v10, %v619_v23  ;;  %v669_v3 = vpop.permute.xlu2 %668 }
 0x1a0   :  { %v667_v38 = vpop.permute.xlu0 %666 }
 0x1a1   :  { %v883_v34 = vsel %vm870_vm8, %v866_v16, %v667_v38 }
 0x1a2   :  { %v900_v11 = vsel %vm887_vm10, %v883_v34, %v715_v24  ;;  %v863_v24 = vsel %vm853_vm9, %v846_v61, %v613_v37  ;;  %v4531_v37 = vld [vmem:[#allocation13_spill] sm:$0xff]  ;;  %v2252_v34 = vld [vmem:[#allocation2 + $0x50] sm:$0xff] }
 0x1a3   :  { %v917_v40 = vsel %vm904_vm11, %v900_v11, %v763_v39  ;;  %v880_v18 = vsel %vm870_vm8, %v863_v24, %v661_v62  ;;  %v841_v62 = vsel %vm836_vm7, %v824_v63, %v3180_v8  ;;  %v4533_v11 = vld [vmem:[#allocation7_spill] sm:$0xff]  ;;  %v2253_v24 = vld [vmem:[#allocation2 + $0xd0] sm:$0xff]  ;;  %v2254_v63 = vld [vmem:[#allocation2 + $0x100] sm:$0xff] }
 0x1a4   :  { %2194 = vmatmul.msk.f32.vlgmr.msra.gmra.mxu3 %vm926_vm12, %v917_v40  ;;  %v858_v17 = vsel %vm853_vm9, %v841_v62, %v3196_v53  ;;  %v850_v53 = vsel %vm836_vm7, %v833_v21, %v3229_v22  ;;  %v796_v22 = vsel %vm141_vm0, %v2688_v35, %v4531_v37  ;;  %v791_v40 = vsel %vm141_vm0, %v2252_v34, %v4533_v11  ;;  %v4541_v62 = vld [vmem:[#allocation9_spill] sm:$0xff]  ;;  %v4546_v37 = vld [vmem:[#allocation28_spill] sm:$0xff] }
 0x1a5   :  { %v813_v2 = vsel %vm802_vm4, %v796_v22, %v4532_v33 }
 0x1a6   :  { %v709_v55 = vpop.permute.xlu1 %708  ;;  %v830_v13 = vsel %vm819_vm6, %v813_v2, %v3138_v27 }
 0x1a7   :  { %v897_v9 = vsel %vm887_vm10, %v880_v18, %v709_v55  ;;  %v717_v30 = vpop.permute.xlu2 %716  ;;  %v847_v12 = vsel %vm836_vm7, %v830_v13, %v3216_v50  ;;  %v808_v50 = vsel %vm802_vm4, %v791_v40, %v4534_v0  ;;  %v4537_v18 = vld [vmem:[#allocation8_spill] sm:$0xff]  ;;  %v4548_v13 = vld [vmem:[#allocation37_spill] sm:$0xff] }
 0x1a8   :  { %v651_v46 = vpop.permute.xlu0 %650  ;;  %v864_v14 = vsel %vm853_vm9, %v847_v12, %v615_v29  ;;  %v825_v29 = vsel %vm819_vm6, %v808_v50, %v4535_v15 }
 0x1a9   :  { %v875_v47 = vsel %vm870_vm8, %v858_v17, %v651_v46  ;;  %v842_v55 = vsel %vm836_vm7, %v825_v29, %v4536_v32  ;;  %v800_v17 = vsel %vm141_vm0, %v2254_v63, %v4541_v62 }
 0x1ae   :  { %v757_v7 = vpop.permute.xlu1 %756 }
 0x1af   :  { %v914_v60 = vsel %vm904_vm11, %v897_v9, %v757_v7  ;;  %v765_v1 = vpop.permute.xlu2 %764  ;;  %v797_v9 = vsel %vm141_vm0, %v2253_v24, %v4537_v18  ;;  %v4538_v7 = vld [vmem:[#allocation24_spill] sm:$0xff] }
 0x1b0   :  { %2191 = vmatmul.msk.f32.gmra.mxu2 %vm926_vm12, %v914_v60  ;;  %v699_v58 = vpop.permute.xlu0 %698  ;;  %v814_v60 = vsel %vm802_vm4, %v797_v9, %v4538_v7 }
 0x1b1   :  { %v892_v51 = vsel %vm887_vm10, %v875_v47, %v699_v58  ;;  %v831_v43 = vsel %vm819_vm6, %v814_v60, %v4539_v5  ;;  %v4542_v47 = vld [vmem:[#allocation27_spill] sm:$0xff] }
 0x1b2   :  { %v848_v58 = vsel %vm836_vm7, %v831_v43, %v4540_v19  ;;  %v817_v6 = vsel %vm802_vm4, %v800_v17, %v4542_v47 }
 0x1b6   :  { %v747_v31 = vpop.permute.xlu1 %746 }
 0x1b7   :  { %v909_v8 = vsel %vm904_vm11, %v892_v51, %v747_v31  ;;  %v617_v23 = vpop.permute.xlu2 %616  ;;  %v4543_v51 = vld [vmem:[#allocation34_spill] sm:$0xff] }
 0x1b8   :  { %2186 = vmatmul.msk.f32.gmra.mxu0 %vm926_vm12, %v909_v8  ;;  %v621_v39 = vpop.permute.xlu0 %620  ;;  %v865_v52 = vsel %vm853_vm9, %v848_v58, %v617_v23  ;;  %v834_v31 = vsel %vm819_vm6, %v817_v6, %v4543_v51  ;;  %v4544_v8 = vld [vmem:[#allocation36_spill] sm:$0xff] }
 0x1b9   :  { %v867_v54 = vsel %vm853_vm9, %v850_v53, %v621_v39  ;;  %v851_v53 = vsel %vm836_vm7, %v834_v31, %v4544_v8 }
 0x1ba   :  { %v884_v59 = vsel %vm870_vm8, %v867_v54, %v669_v3 }
 0x1bb   :  { %v901_v4 = vsel %vm887_vm10, %v884_v59, %v717_v30 }
 0x1bc   :  { %v918_v20 = vsel %vm904_vm11, %v901_v4, %v765_v1 }
 0x1bd   :  { %2195 = vmatmul.msk.f32.gmra.mxu3 %vm926_vm12, %v918_v20 }
 0x1be   :  { %v663_v49 = vpop.permute.xlu1 %662 }
 0x1bf   :  { %v881_v10 = vsel %vm870_vm8, %v864_v14, %v663_v49  ;;  %v671_v3 = vpop.permute.xlu2 %670  ;;  %v2255_v49 = vld [vmem:[#allocation2 + $0x110] sm:$0xff] }
 0x1c0   :  { %v605_v36 = vpop.permute.xlu0 %604 }
 0x1c1   :  { %v859_v28 = vsel %vm853_vm9, %v842_v55, %v605_v36  ;;  %v4545_v36 = vld [vmem:[#allocation17_spill] sm:$0xff] }
 0x1c6   :  { %v711_v44 = vpop.permute.xlu1 %710 }
 0x1c7   :  { %v898_v16 = vsel %vm887_vm10, %v881_v10, %v711_v44  ;;  %v761_v30 = vpop.permute.xlu2 %760  ;;  %v801_v44 = vsel %vm141_vm0, %v2255_v49, %v4545_v36 }
 0x1c8   :  { %v653_v25 = vpop.permute.xlu0 %652  ;;  %v818_v22 = vsel %vm802_vm4, %v801_v44, %v4546_v37 }
 0x1c9   :  { %v876_v57 = vsel %vm870_vm8, %v859_v28, %v653_v25  ;;  %v4547_v25 = vld [vmem:[#allocation30_spill] sm:$0xff] }
 0x1ca   :  { %v835_v33 = vsel %vm819_vm6, %v818_v22, %v4547_v25  ;;  %vm1967_vm6 = vcmask 392192  }
 0x1cb   :  { %v852_v12 = vsel %vm836_vm7, %v835_v33, %v4548_v13 }
 0x1ce   :  { %v759_v38 = vpop.permute.xlu1 %758 }
 0x1cf   :  { %v915_v35 = vsel %vm904_vm11, %v898_v16, %v759_v38  ;;  %v673_v23 = vpop.permute.xlu2 %672 }
 0x1d0   :  { %2192 = vmatmul.msk.f32.gmra.mxu2 %vm926_vm12, %v915_v35  ;;  %v701_v27 = vpop.permute.xlu0 %700 }
 0x1d1   :  { %v893_v45 = vsel %vm887_vm10, %v876_v57, %v701_v27 }
 0x1d6   :  { %v749_v48 = vpop.permute.xlu1 %748 }
 0x1d7   :  { %v910_v46 = vsel %vm904_vm11, %v893_v45, %v749_v48 }
 0x1d8   :  { %2187 = vmatmul.msk.f32.gmra.mxu0 %vm926_vm12, %v910_v46  ;;  %v623_v61 = vpop.permute.xlu0 %622 }
 0x1d9   :  { %v868_v39 = vsel %vm853_vm9, %v851_v53, %v623_v61 }
 0x1da   :  { %v885_v59 = vsel %vm870_vm8, %v868_v39, %v671_v3 }
 0x1de   :  { %v665_v56 = vpop.permute.xlu1 %664  ;;  %v3511_v11 = vpop.f32.mrf.mxu0 }
 0x1df   :  { %v882_v42 = vsel %vm870_vm8, %v865_v52, %v665_v56  ;;  %v1083_v55 = vmul.f32 %v3511_v11, %v3511_v11  ;;  %v1046_v45 = vsel %vm802_vm4, %v3511_v11, 0.0 }
 0x1e0   :  { %v713_v26 = vpop.permute.xlu0 %712 }
 0x1e1   :  { %v899_v41 = vsel %vm887_vm10, %v882_v42, %v713_v26  ;;  %v1099_v18 = vsel %vm802_vm4, %v1083_v55, 0.0 }
 0x1e2   :  { %v916_v21 = vsel %vm904_vm11, %v899_v41, %v761_v30 }
 0x1e3   :  { %2193 = vmatmul.msk.f32.gmra.mxu2 %vm926_vm12, %v916_v21 }
 0x1e6   :  { %v719_v54 = vpop.permute.xlu1 %718 }
 0x1e7   :  { %v902_v1 = vsel %vm887_vm10, %v885_v59, %v719_v54 }
 0x1e8   :  { %v767_v4 = vpop.permute.xlu0 %766 }
 0x1e9   :  { %v919_v20 = vsel %vm904_vm11, %v902_v1, %v767_v4 }
 0x1ea   :  { %2196 = vmatmul.msk.f32.gmra.mxu3 %vm926_vm12, %v919_v20 }
 0x1ee   :  { %v625_v2 = vpop.permute.xlu1 %624 }
 0x1ef   :  { %v869_v14 = vsel %vm853_vm9, %v852_v12, %v625_v2  ;;  %v3513_v40 = vpop.f32.mrf.mxu0  ;;  %vm1984_vm9 = vcmask 457728  }
 0x1f0   :  { %v886_v10 = vsel %vm870_vm8, %v869_v14, %v673_v23  ;;  %v721_v16 = vpop.permute.xlu0 %720  ;;  %v1084_v29 = vmul.f32 %v3513_v40, %v3513_v40  ;;  %v1047_v28 = vsel %vm802_vm4, %v3513_v40, 0.0 }
 0x1f1   :  { %v903_v38 = vsel %vm887_vm10, %v886_v10, %v721_v16  ;;  %v1048_v24 = vadd.f32 %v1047_v28, %v1046_v45  ;;  %vm2001_vm10 = vcmask 523264  }
 0x1f2   :  { %v1100_v48 = vsel %vm802_vm4, %v1084_v29, 0.0 }
 0x1f3   :  { %v3517_v0 = vpop.f32.mrf.mxu2  ;;  %v1101_v5 = vadd.f32 %v1100_v48, %v1099_v18 }
 0x1f4   :  { %v1089_v31 = vmul.f32 %v3517_v0, %v3517_v0  ;;  %v1057_v8 = vsel %vm802_vm4, %v3517_v0, 0.0 }
 0x1f6   :  { %v769_v35 = vpop.permute.xlu1 %768  ;;  %v1110_v39 = vsel %vm802_vm4, %v1089_v31, 0.0 }
 0x1f7   :  { %v920_v34 = vsel %vm904_vm11, %v903_v38, %v769_v35 }
 0x1f8   :  { %2197 = vmatmul.msk.f32.gmra.mxu3 %vm926_vm12, %v920_v34  ;;  %vm2019_vm12 = vcmask 588800  }
 0x1fe   :  { %v3521_v15 = vpop.f32.mrf.mxu2 }
 0x1ff   :  { %v1090_v54 = vmul.f32 %v3521_v15, %v3521_v15  ;;  %v1059_v4 = vsel %vm802_vm4, %v3521_v15, 0.0 }
 0x201   :  { %v1112_v49 = vsel %vm802_vm4, %v1090_v54, 0.0 }
 0x205   :  { %v3515_v27 = vpop.f32.mrf.mxu0 }
 0x206   :  { %v1085_v57 = vmul.f32 %v3515_v27, %v3515_v27  ;;  %v1049_v46 = vsel %vm802_vm4, %v3515_v27, 0.0 }
 0x207   :  { %v1050_v43 = vadd.f32 %v1049_v46, %v1048_v24 }
 0x208   :  { %v1102_v9 = vsel %vm802_vm4, %v1085_v57, 0.0 }
 0x209   :  { %v1103_v56 = vadd.f32 %v1102_v9, %v1101_v5 }
 0x215   :  { %v3533_v3 = vpop.f32.mrf.mxu2 }
 0x216   :  { %v3519_v50 = vpop.f32.mrf.mxu0  ;;  %v1091_v36 = vmul.f32 %v3533_v3, %v3533_v3  ;;  %v1061_v22 = vsel %vm802_vm4, %v3533_v3, 0.0 }
 0x217   :  { %v1086_v61 = vmul.f32 %v3519_v50, %v3519_v50  ;;  %v1051_v7 = vsel %vm802_vm4, %v3519_v50, 0.0 }
 0x218   :  { %v1052_v52 = vadd.f32 %v1051_v7, %v1050_v43  ;;  %v1114_v33 = vsel %vm802_vm4, %v1091_v36, 0.0 }
 0x219   :  { %v1104_v19 = vsel %vm802_vm4, %v1086_v61, 0.0  ;;  %v2265_v61 = vmov 128.0  }
 0x21a   :  { %v1105_v42 = vadd.f32 %v1104_v19, %v1103_v56  ;;  %2243 = vrcp.f32 %v2265_v61 }
 0x220   :  { %v2244_v19 = vpop.eup %2243 }
 0x221   :  { %vm1141_vm14 = vweird.f32 %v2244_v19 }
 0x227   :  { %v3575_v44 = vpop.f32.mrf.mxu3 }
 0x228   :  { %v1095_v24 = vmul.f32 %v3575_v44, %v3575_v44  ;;  %v1069_v9 = vsel %vm802_vm4, %v3575_v44, 0.0 }
 0x22a   :  { %v1122_v5 = vsel %vm802_vm4, %v1095_v24, 0.0 }
 0x233   :  { %v3558_v26 = vpop.f32.mrf.mxu2 }
 0x234   :  { %v1092_v2 = vmul.f32 %v3558_v26, %v3558_v26  ;;  %v1063_v14 = vsel %vm802_vm4, %v3558_v26, 0.0 }
 0x235   :  { %v3525_v32 = vpop.f32.mrf.mxu0 }
 0x236   :  { %v1087_v60 = vmul.f32 %v3525_v32, %v3525_v32  ;;  %v1053_v58 = vsel %vm802_vm4, %v3525_v32, 0.0  ;;  %v1116_v10 = vsel %vm802_vm4, %v1092_v2, 0.0 }
 0x237   :  { %v1054_v47 = vadd.f32 %v1053_v58, %v1052_v52 }
 0x238   :  { %v1106_v63 = vsel %vm802_vm4, %v1087_v60, 0.0 }
 0x239   :  { %v1107_v41 = vadd.f32 %v1106_v63, %v1105_v42  ;;  %v1137_v42 = vmul.f32 128.0, %v2244_v19 }
 0x240   :  { %v3591_v35 = vpop.f32.mrf.mxu3 }
 0x241   :  { %v1096_v43 = vmul.f32 %v3591_v35, %v3591_v35  ;;  %v1071_v56 = vsel %vm802_vm4, %v3591_v35, 0.0 }
 0x253   :  { %v3568_v59 = vpop.f32.mrf.mxu2 }
 0x254   :  { %v1093_v16 = vmul.f32 %v3568_v59, %v3568_v59  ;;  %v1065_v29 = vsel %vm802_vm4, %v3568_v59, 0.0 }
 0x255   :  { %v3551_v30 = vpop.f32.mrf.mxu0 }
 0x256   :  { %v1055_v62 = vsel %vm802_vm4, %v3551_v30, 0.0  ;;  %v1088_v17 = vmul.f32 %v3551_v30, %v3551_v30  ;;  %v1118_v57 = vsel %vm802_vm4, %v1093_v16, 0.0 }
 0x257   :  { %v1056_v51 = vadd.f32 %v1055_v62, %v1054_v47  ;;  %v1124_v62 = vsel %vm802_vm4, %v1096_v43, 0.0 }
 0x258   :  { %v1108_v6 = vsel %vm802_vm4, %v1088_v17, 0.0 }
 0x259   :  { %v1109_v21 = vadd.f32 %v1108_v6, %v1107_v41  ;;  %v1058_v53 = vadd.f32 %v1057_v8, %v1056_v51  ;;  %v1138_v8 = vsub.f32 1.0, %v1137_v42 }
 0x25b   :  { %v1111_v1 = vadd.f32 %v1110_v39, %v1109_v21  ;;  %v1060_v20 = vadd.f32 %v1059_v4, %v1058_v53 }
 0x25d   :  { %v1113_v37 = vadd.f32 %v1112_v49, %v1111_v1  ;;  %v1062_v25 = vadd.f32 %v1061_v22, %v1060_v20  ;;  %v1139_v20 = vmul.f32 %v2244_v19, %v1138_v8 }
 0x25f   :  { %v1115_v12 = vadd.f32 %v1114_v33, %v1113_v37  ;;  %v1064_v23 = vadd.f32 %v1063_v14, %v1062_v25  ;;  %v1140_v25 = vadd.f32 %v2244_v19, %v1139_v20 }
 0x261   :  { %v1117_v34 = vadd.f32 %v1116_v10, %v1115_v12  ;;  %v1066_v28 = vadd.f32 %v1065_v29, %v1064_v23  ;;  %v4549_v12 = vmov 0.0   ;;  %v3629_v10 = vsel %vm1141_vm14, %v2244_v19, %v1140_v25 }
 0x262   :  { %1282 = vst.msk [vmem:[#allocation3 + $0x128] sm:$0x3] %vm1245_vm13, %v4549_v12 }
 0x263   :  { %v1119_v46 = vadd.f32 %v1118_v57, %v1117_v34  ;;  %1246 = vst.msk [vmem:[#allocation3 + $0x8] sm:$0x3] %vm1245_vm13, %v4549_v12 }
 0x264   :  { %1248 = vst.msk [vmem:[#allocation3 + $0x18] sm:$0x3] %vm1245_vm13, %v4549_v12 }
 0x265   :  { %4550 = vst [vmem:[#allocation22_spill] sm:$0xff] %v3629_v10 }
 0x266   :  { %v3582_v13 = vpop.f32.mrf.mxu2  ;;  %1250 = vst.msk [vmem:[#allocation3 + $0x28] sm:$0x3] %vm1245_vm13, %v4549_v12 }
 0x267   :  { %v1094_v38 = vmul.f32 %v3582_v13, %v3582_v13  ;;  %v1067_v55 = vsel %vm802_vm4, %v3582_v13, 0.0  ;;  %1252 = vst.msk [vmem:[#allocation3 + $0x38] sm:$0x3] %vm1245_vm13, %v4549_v12 }
 0x268   :  { %v1068_v48 = vadd.f32 %v1067_v55, %v1066_v28  ;;  %1254 = vst.msk [vmem:[#allocation3 + $0x48] sm:$0x3] %vm1245_vm13, %v4549_v12  ;;  %v3644_v55 = vld [vmem:[#allocation3] sm:$0xff] }
 0x269   :  { %v1120_v45 = vsel %vm802_vm4, %v1094_v38, 0.0  ;;  %1256 = vst.msk [vmem:[#allocation3 + $0x58] sm:$0x3] %vm1245_vm13, %v4549_v12 }
 0x26a   :  { %v1121_v18 = vadd.f32 %v1120_v45, %v1119_v46  ;;  %v1070_v7 = vadd.f32 %v1069_v9, %v1068_v48  ;;  %1258 = vst.msk [vmem:[#allocation3 + $0x68] sm:$0x3] %vm1245_vm13, %v4549_v12  ;;  %v3651_v45 = vld [vmem:[#allocation3 + $0x8] sm:$0x3]  ;;  %v1374_v48 = vrot.slane %v3644_v55, 1  ;;  %v3669_v9 = vld [vmem:[#allocation3 + $0xa0] sm:$0xff] }
 0x26b   :  { %1260 = vst.msk [vmem:[#allocation3 + $0x78] sm:$0x3] %vm1245_vm13, %v4549_v12  ;;  %v1375_v46 = vrot.slane %v3651_v45, 1 }
 0x26c   :  { %v1123_v58 = vadd.f32 %v1122_v5, %v1121_v18  ;;  %v1072_v63 = vadd.f32 %v1071_v56, %v1070_v7  ;;  %1262 = vst.msk [vmem:[#allocation3 + $0x88] sm:$0x3] %vm1245_vm13, %v4549_v12  ;;  %v1398_v7 = vrot.slane %v3669_v9, 1 }
 0x26d   :  { %v3603_v60 = vpop.f32.mrf.mxu3  ;;  %1264 = vst.msk [vmem:[#allocation3 + $0x98] sm:$0x3] %vm1245_vm13, %v4549_v12  ;;  %v1376_v24 = vsel %vm272_vm2, %v1374_v48, %v1375_v46 }
 0x26e   :  { %v1097_v52 = vmul.f32 %v3603_v60, %v3603_v60  ;;  %v1073_v17 = vsel %vm802_vm4, %v3603_v60, 0.0  ;;  %v1125_v47 = vadd.f32 %v1124_v62, %v1123_v58  ;;  %1266 = vst.msk [vmem:[#allocation3 + $0xa8] sm:$0x3] %vm1245_vm13, %v4549_v12  ;;  %1502 = vrot.lane.b32.xlu2 %v1376_v24, %s2258_s27 }
 0x26f   :  { %v1074_v41 = vadd.f32 %v1073_v17, %v1072_v63  ;;  %1268 = vst.msk [vmem:[#allocation3 + $0xb8] sm:$0x3] %vm1245_vm13, %v4549_v12 }
 0x270   :  { %v1126_v6 = vsel %vm802_vm4, %v1097_v52, 0.0  ;;  %1270 = vst.msk [vmem:[#allocation3 + $0xc8] sm:$0x3] %vm1245_vm13, %v4549_v12 }
 0x271   :  { %v1127_v53 = vadd.f32 %v1126_v6, %v1125_v47  ;;  %1272 = vst.msk [vmem:[#allocation3 + $0xd8] sm:$0x3] %vm1245_vm13, %v4549_v12 }
 0x272   :  { %1274 = vst.msk [vmem:[#allocation3 + $0xe8] sm:$0x3] %vm1245_vm13, %v4549_v12 }
 0x273   :  { %1276 = vst.msk [vmem:[#allocation3 + $0xf8] sm:$0x3] %vm1245_vm13, %v4549_v12 }
 0x274   :  { %1278 = vst.msk [vmem:[#allocation3 + $0x108] sm:$0x3] %vm1245_vm13, %v4549_v12 }
 0x275   :  { %1280 = vst.msk [vmem:[#allocation3 + $0x118] sm:$0x3] %vm1245_vm13, %v4549_v12  ;;  %v3680_v5 = vld [vmem:[#allocation3 + $0xa8] sm:$0x3] }
 0x276   :  { %1284 = vst.msk [vmem:[#allocation3 + $0x138] sm:$0x3] %vm1245_vm13, %v4549_v12  ;;  %v1399_v43 = vrot.slane %v3680_v5, 1 }
 0x278   :  { %v1400_v56 = vsel %vm272_vm2, %v1398_v7, %v1399_v43 }
 0x279   :  { %1518 = vrot.lane.b32.xlu1 %v1400_v56, %s2258_s27 }
 0x27b   :  { %v3616_v51 = vpop.f32.mrf.mxu3 }
 0x27c   :  { %v1075_v31 = vsel %vm802_vm4, %v3616_v51, 0.0  ;;  %v1098_v21 = vmul.f32 %v3616_v51, %v3616_v51 }
 0x27d   :  { %v1076_v39 = vadd.f32 %v1075_v31, %v1074_v41 }
 0x27e   :  { %v1128_v54 = vsel %vm802_vm4, %v1098_v21, 0.0 }
 0x27f   :  { %v1077_v1 = vrot.slane %v1076_v39, 4  ;;  %v1129_v4 = vadd.f32 %v1128_v54, %v1127_v53 }
 0x281   :  { %v1078_v49 = vadd.f32 %v1077_v1, %v1076_v39  ;;  %v1130_v36 = vrot.slane %v1129_v4, 4 }
 0x283   :  { %v1079_v37 = vrot.slane %v1078_v49, 2  ;;  %v1131_v22 = vadd.f32 %v1130_v36, %v1129_v4 }
 0x285   :  { %v1080_v33 = vadd.f32 %v1079_v37, %v1078_v49  ;;  %v1132_v2 = vrot.slane %v1131_v22, 2 }
 0x287   :  { %v1081_v14 = vrot.slane %v1080_v33, 1  ;;  %v1133_v23 = vadd.f32 %v1132_v2, %v1131_v22 }
 0x289   :  { %v1082_v16 = vadd.f32 %v1081_v14, %v1080_v33  ;;  %v1134_v38 = vrot.slane %v1133_v23, 1 }
 0x28b   :  { %v1135_v34 = vadd.f32 %v1134_v38, %v1133_v23  ;;  %v3638_v29 = vmul.f32 %v3629_v10, %v1082_v16 }
 0x28d   :  { %v1144_v28 = vmul.f32 %v3629_v10, %v1135_v34  ;;  %v1145_v57 = vmul.f32 %v3638_v29, %v3638_v29  ;;  %v1173_v17 = vsub.f32 %v3616_v51, %v3638_v29  ;;  %v1160_v42 = vsub.f32 %v3515_v27, %v3638_v29 }
 0x28e   :  { %v1159_v47 = vsub.f32 %v3513_v40, %v3638_v29  ;;  %v1158_v6 = vsub.f32 %v3511_v11, %v3638_v29  ;;  %v1163_v41 = vsub.f32 %v3551_v30, %v3638_v29  ;;  %v1162_v31 = vsub.f32 %v3525_v32, %v3638_v29  ;;  %v3706_v40 = vld [vmem:[%s4468_s2] ss:$0 sm:$0xff] }
 0x28f   :  { %v1146_v61 = vsub.f32 %v1144_v28, %v1145_v57  ;;  %v1161_v51 = vsub.f32 %v3519_v50, %v3638_v29  ;;  %v1166_v27 = vsub.f32 %v3533_v3, %v3638_v29  ;;  %v1168_v11 = vsub.f32 %v3568_v59, %v3638_v29 }
 0x290   :  { %v1164_v32 = vsub.f32 %v3517_v0, %v3638_v29  ;;  %v1169_v30 = vsub.f32 %v3582_v13, %v3638_v29  ;;  %v1171_v50 = vsub.f32 %v3591_v35, %v3638_v29  ;;  %v1167_v3 = vsub.f32 %v3558_v26, %v3638_v29  ;;  %v3725_v0 = vld [vmem:[%s4469_s3] ss:$0 sm:$0xff]  ;;  %s2266_s3 = smov 48  }
 0x291   :  { %v1147_v18 = vadd.f32 1e-05, %v1146_v61  ;;  %v1172_v53 = vsub.f32 %v3603_v60, %v3638_v29  ;;  %v1170_v39 = vsub.f32 %v3575_v44, %v3638_v29  ;;  %v1165_v28 = vsub.f32 %v3521_v15, %v3638_v29 }
 0x293   :  { %2245 = vrsqrt.f32 %v1147_v18  ;;  %vm1154_vm0 = vweird.f32 %v1147_v18 }
 0x299   :  { %v2246_v19 = vpop.eup %2245 }
 0x29a   :  { %v1149_v58 = vmul.f32 %v2246_v19, %v1147_v18  ;;  %vm1155_vm15 = vweird.f32 %v2246_v19 }
 0x29b   :  { %vm1156_vm1 = vmor %vm1154_vm0, %vm1155_vm15 }
 0x29c   :  { %v1150_v52 = vmul.f32 %v2246_v19, %v1149_v58 }
 0x29e   :  { %v1151_v63 = vmul.f32 0.5, %v1150_v52 }
 0x2a0   :  { %v1152_v62 = vsub.f32 1.5, %v1151_v63 }
 0x2a2   :  { %v1153_v21 = vmul.f32 %v2246_v19, %v1152_v62 }
 0x2a4   :  { %v1157_v8 = vsel %vm1156_vm1, %v2246_v19, %v1153_v21 }
 0x2a5   :  { %v1189_v59 = vmul.f32 %v1173_v17, %v1157_v8  ;;  %v1176_v13 = vmul.f32 %v1160_v42, %v1157_v8  ;;  %v1175_v54 = vmul.f32 %v1159_v47, %v1157_v8  ;;  %v1174_v1 = vmul.f32 %v1158_v6, %v1157_v8 }
 0x2a6   :  { %v1179_v35 = vmul.f32 %v1163_v41, %v1157_v8  ;;  %v1178_v4 = vmul.f32 %v1162_v31, %v1157_v8  ;;  %v1177_v20 = vmul.f32 %v1161_v51, %v1157_v8  ;;  %v1182_v49 = vmul.f32 %v1166_v27, %v1157_v8 }
 0x2a7   :  { %v1208_v26 = vmul.f32 %v3706_v40, %v1189_v59  ;;  %v1195_v60 = vmul.f32 %v3706_v40, %v1176_v13  ;;  %v1194_v36 = vmul.f32 %v3706_v40, %v1175_v54  ;;  %v1193_v44 = vmul.f32 %v3706_v40, %v1174_v1 }
 0x2a8   :  { %v1198_v37 = vmul.f32 %v3706_v40, %v1179_v35  ;;  %v1197_v22 = vmul.f32 %v3706_v40, %v1178_v4  ;;  %v1196_v25 = vmul.f32 %v3706_v40, %v1177_v20  ;;  %v1201_v33 = vmul.f32 %v3706_v40, %v1182_v49 }
 0x2a9   :  { %v1227_v2 = vadd.f32 %v3725_v0, %v1208_v26  ;;  %v1214_v12 = vadd.f32 %v3725_v0, %v1195_v60  ;;  %v1213_v14 = vadd.f32 %v3725_v0, %v1194_v36  ;;  %v1212_v23 = vadd.f32 %v3725_v0, %v1193_v44 }
 0x2aa   :  { %v1217_v16 = vadd.f32 %v3725_v0, %v1198_v37  ;;  %v1216_v38 = vadd.f32 %v3725_v0, %v1197_v22  ;;  %v1215_v34 = vadd.f32 %v3725_v0, %v1196_v25  ;;  %v1220_v61 = vadd.f32 %v3725_v0, %v1201_v33 }
 0x2ab   :  { %v1243_v57 = vmax.f32 %v1227_v2, 0.0  ;;  %v1230_v48 = vmax.f32 %v1214_v12, 0.0  ;;  %v1229_v46 = vmax.f32 %v1213_v14, 0.0  ;;  %v1228_v24 = vmax.f32 %v1212_v23, 0.0 }
 0x2ac   :  { %v1233_v18 = vmax.f32 %v1217_v16, 0.0  ;;  %v1232_v7 = vmax.f32 %v1216_v38, 0.0  ;;  %v1231_v43 = vmax.f32 %v1215_v34, 0.0  ;;  %v1184_v19 = vmul.f32 %v1168_v11, %v1157_v8 }
 0x2ad   :  { %1301 = vst.msk [vmem:[#allocation3 + $0x121] sm:$0xff] %vm802_vm4, %v1243_v57  ;;  %v1180_v58 = vmul.f32 %v1164_v32, %v1157_v8  ;;  %v1185_v56 = vmul.f32 %v1169_v30, %v1157_v8  ;;  %v1187_v52 = vmul.f32 %v1171_v50, %v1157_v8  ;;  %v1183_v63 = vmul.f32 %v1167_v3, %v1157_v8 }
 0x2ae   :  { %1288 = vst.msk [vmem:[#allocation3 + $0x31] sm:$0xff] %vm802_vm4, %v1230_v48  ;;  %v1188_v62 = vmul.f32 %v1172_v53, %v1157_v8  ;;  %v1186_v15 = vmul.f32 %v1170_v39, %v1157_v8  ;;  %v1181_v29 = vmul.f32 %v1165_v28, %v1157_v8  ;;  %v1203_v17 = vmul.f32 %v3706_v40, %v1184_v19 }
 0x2af   :  { %1287 = vst.msk [vmem:[#allocation3 + $0x21] sm:$0xff] %vm802_vm4, %v1229_v46  ;;  %v1199_v42 = vmul.f32 %v3706_v40, %v1180_v58  ;;  %v1204_v47 = vmul.f32 %v3706_v40, %v1185_v56  ;;  %v1206_v6 = vmul.f32 %v3706_v40, %v1187_v52  ;;  %v1236_v41 = vmax.f32 %v1220_v61, 0.0 }
 0x2b0   :  { %1286 = vst.msk [vmem:[#allocation3 + $0x11] sm:$0xff] %vm802_vm4, %v1228_v24  ;;  %v1202_v31 = vmul.f32 %v3706_v40, %v1183_v63  ;;  %v1207_v21 = vmul.f32 %v3706_v40, %v1188_v62  ;;  %v1205_v51 = vmul.f32 %v3706_v40, %v1186_v15  ;;  %v1222_v27 = vadd.f32 %v3725_v0, %v1203_v17 }
 0x2b1   :  { %1291 = vst.msk [vmem:[#allocation3 + $0x61] sm:$0xff] %vm802_vm4, %v1233_v18  ;;  %v1218_v11 = vadd.f32 %v3725_v0, %v1199_v42  ;;  %v1223_v32 = vadd.f32 %v3725_v0, %v1204_v47  ;;  %v1225_v30 = vadd.f32 %v3725_v0, %v1206_v6  ;;  %v1200_v3 = vmul.f32 %v3706_v40, %v1181_v29 }
 0x2b2   :  { %1290 = vst.msk [vmem:[#allocation3 + $0x51] sm:$0xff] %vm802_vm4, %v1232_v7  ;;  %v1221_v50 = vadd.f32 %v3725_v0, %v1202_v31  ;;  %v1226_v8 = vadd.f32 %v3725_v0, %v1207_v21  ;;  %v1238_v53 = vmax.f32 %v1222_v27, 0.0  ;;  %v1224_v20 = vadd.f32 %v3725_v0, %v1205_v51 }
 0x2b3   :  { %1289 = vst.msk [vmem:[#allocation3 + $0x41] sm:$0xff] %vm802_vm4, %v1231_v43  ;;  %v1234_v39 = vmax.f32 %v1218_v11, 0.0  ;;  %v1239_v59 = vmax.f32 %v1223_v32, 0.0  ;;  %v1241_v13 = vmax.f32 %v1225_v30, 0.0  ;;  %v1219_v36 = vadd.f32 %v3725_v0, %v1200_v3 }
 0x2b4   :  { %1294 = vst.msk [vmem:[#allocation3 + $0xb1] sm:$0xff] %vm802_vm4, %v1236_v41  ;;  %v1237_v35 = vmax.f32 %v1221_v50, 0.0  ;;  %v1242_v4 = vmax.f32 %v1226_v8, 0.0  ;;  %v1240_v16 = vmax.f32 %v1224_v20, 0.0 }
 0x2b5   :  { %v3767_v54 = vld [vmem:[#allocation3 + $0x30] sm:$0xff]  ;;  %v3769_v1 = vld [vmem:[#allocation3 + $0x38] sm:$0x3]  ;;  %1296 = vst.msk [vmem:[#allocation3 + $0xd1] sm:$0xff] %vm802_vm4, %v1238_v53  ;;  %v1235_v57 = vmax.f32 %v1219_v36, 0.0 }
 0x2b6   :  { %v1383_v40 = vrot.slane %v3767_v54, 1  ;;  %v1384_v49 = vrot.slane %v3769_v1, 1  ;;  %v3775_v26 = vld [vmem:[#allocation3 + $0x20] sm:$0xff]  ;;  %v3777_v60 = vld [vmem:[#allocation3 + $0x28] sm:$0x3]  ;;  %1292 = vst.msk [vmem:[#allocation3 + $0x71] sm:$0xff] %vm802_vm4, %v1234_v39 }
 0x2b7   :  { %v1380_v44 = vrot.slane %v3775_v26, 1  ;;  %v1381_v37 = vrot.slane %v3777_v60, 1  ;;  %v3783_v22 = vld [vmem:[#allocation3 + $0x10] sm:$0xff]  ;;  %v3785_v25 = vld [vmem:[#allocation3 + $0x18] sm:$0x3]  ;;  %1297 = vst.msk [vmem:[#allocation3 + $0xe1] sm:$0xff] %vm802_vm4, %v1239_v59 }
 0x2b8   :  { %v3789_v33 = vsel %vm272_vm2, %v1383_v40, %v1384_v49  ;;  %v1377_v2 = vrot.slane %v3783_v22, 1  ;;  %v1378_v12 = vrot.slane %v3785_v25, 1  ;;  %1299 = vst.msk [vmem:[#allocation3 + $0x101] sm:$0xff] %vm802_vm4, %v1241_v13  ;;  %v3799_v14 = vld [vmem:[#allocation3 + $0x60] sm:$0xff]  ;;  %v3801_v23 = vld [vmem:[#allocation3 + $0x68] sm:$0x3] }
 0x2b9   :  { %1508 = vrot.lane.b32.xlu2 %v3789_v33, %s2258_s27  ;;  %v3797_v0 = vsel %vm272_vm2, %v1380_v44, %v1381_v37  ;;  %1295 = vst.msk [vmem:[#allocation3 + $0xc1] sm:$0xff] %vm802_vm4, %v1237_v35  ;;  %v3809_v34 = vld [vmem:[#allocation3 + $0x50] sm:$0xff]  ;;  %v3811_v28 = vld [vmem:[#allocation3 + $0x58] sm:$0x3]  ;;  %v1392_v61 = vrot.slane %v3799_v14, 1  ;;  %v1393_v24 = vrot.slane %v3801_v23, 1 }
 0x2ba   :  { %1506 = vrot.lane.b32.xlu1 %v3797_v0, %s2258_s27  ;;  %v3807_v38 = vsel %vm272_vm2, %v1377_v2, %v1378_v12  ;;  %1300 = vst.msk [vmem:[#allocation3 + $0x111] sm:$0xff] %vm802_vm4, %v1242_v4  ;;  %v3816_v48 = vld [vmem:[#allocation3 + $0x40] sm:$0xff]  ;;  %v3818_v46 = vld [vmem:[#allocation3 + $0x48] sm:$0x3]  ;;  %v1389_v18 = vrot.slane %v3809_v34, 1  ;;  %v1390_v7 = vrot.slane %v3811_v28, 1 }
 0x2bb   :  { %1504 = vrot.lane.b32.xlu0 %v3807_v38, %s2258_s27  ;;  %1298 = vst.msk [vmem:[#allocation3 + $0xf1] sm:$0xff] %vm802_vm4, %v1240_v16  ;;  %v1386_v43 = vrot.slane %v3816_v48, 1  ;;  %v1387_v19 = vrot.slane %v3818_v46, 1  ;;  %v3829_v58 = vsel %vm272_vm2, %v1392_v61, %v1393_v24  ;;  %v3836_v52 = vld [vmem:[#allocation3 + $0xb0] sm:$0xff]  ;;  %v3838_v63 = vld [vmem:[#allocation3 + $0xb8] sm:$0x3] }
 0x2bc   :  { %1293 = vst.msk [vmem:[#allocation3 + $0x81] sm:$0xff] %vm802_vm4, %v1235_v57  ;;  %v3834_v56 = vsel %vm272_vm2, %v1389_v18, %v1390_v7  ;;  %v3845_v15 = vld [vmem:[#allocation3 + $0xd0] sm:$0xff]  ;;  %v3847_v29 = vld [vmem:[#allocation3 + $0xd8] sm:$0x3]  ;;  %v1401_v47 = vrot.slane %v3836_v52, 1  ;;  %v1402_v6 = vrot.slane %v3838_v63, 1 }
 0x2bd   :  { %v3843_v62 = vsel %vm272_vm2, %v1386_v43, %v1387_v19  ;;  %v3851_v17 = vld [vmem:[#allocation3 + $0x70] sm:$0xff]  ;;  %v3853_v42 = vld [vmem:[#allocation3 + $0x78] sm:$0x3]  ;;  %v1407_v41 = vrot.slane %v3845_v15, 1  ;;  %v1408_v31 = vrot.slane %v3847_v29, 1  ;;  %v1425_v24 = vrot.slane %v3783_v22, 2 }
 0x2be   :  { %v1395_v21 = vrot.slane %v3851_v17, 1  ;;  %v1396_v51 = vrot.slane %v3853_v42, 1  ;;  %v3862_v27 = vsel %vm272_vm2, %v1401_v47, %v1402_v6  ;;  %v3869_v32 = vld [vmem:[#allocation3 + $0xe0] sm:$0xff]  ;;  %v3871_v30 = vld [vmem:[#allocation3 + $0xe8] sm:$0x3]  ;;  %v1426_v18 = vrot.slane %v3785_v25, 2 }
 0x2bf   :  { %v3867_v11 = vsel %vm272_vm2, %v1407_v41, %v1408_v31  ;;  %v3878_v8 = vld [vmem:[#allocation3 + $0x100] sm:$0xff]  ;;  %v3880_v3 = vld [vmem:[#allocation3 + $0x108] sm:$0x3]  ;;  %v1410_v59 = vrot.slane %v3869_v32, 1  ;;  %v1411_v13 = vrot.slane %v3871_v30, 1  ;;  %v1428_v25 = vrot.slane %v3775_v26, 2 }
 0x2c0   :  { %v3876_v50 = vsel %vm272_vm2, %v1395_v21, %v1396_v51  ;;  %v3884_v53 = vld [vmem:[#allocation3 + $0xc0] sm:$0xff]  ;;  %v3886_v39 = vld [vmem:[#allocation3 + $0xc8] sm:$0x3]  ;;  %v1416_v35 = vrot.slane %v3878_v8, 1  ;;  %v1417_v4 = vrot.slane %v3880_v3, 1  ;;  %v3926_v47 = vsel %vm321_vm3, %v1425_v24, %v1426_v18 }
 0x2c1   :  { %1514 = vrot.lane.b32.xlu2 %v3829_v58, %s2258_s27  ;;  %v1404_v20 = vrot.slane %v3884_v53, 1  ;;  %v1405_v40 = vrot.slane %v3886_v39, 1  ;;  %v3895_v49 = vsel %vm272_vm2, %v1410_v59, %v1411_v13  ;;  %v3902_v44 = vld [vmem:[#allocation3 + $0x110] sm:$0xff]  ;;  %v3904_v37 = vld [vmem:[#allocation3 + $0x118] sm:$0x3]  ;;  %4551 = vst [vmem:[#allocation10_spill] sm:$0xff] %v3926_v47 }
 0x2c2   :  { %1512 = vrot.lane.b32.xlu1 %v3834_v56, %s2258_s27  ;;  %v3900_v36 = vsel %vm272_vm2, %v1416_v35, %v1417_v4  ;;  %v3913_v12 = vld [vmem:[#allocation3 + $0xf0] sm:$0xff]  ;;  %v1333_v16 = vld [vmem:[#allocation3 + $0xf8] sm:$0x3]  ;;  %v1419_v57 = vrot.slane %v3902_v44, 1  ;;  %v1420_v61 = vrot.slane %v3904_v37, 1  ;;  %v1429_v41 = vrot.slane %v3777_v60, 2 }
 0x2c3   :  { %1510 = vrot.lane.b32.xlu0 %v3843_v62, %s2258_s27  ;;  %v3909_v2 = vsel %vm272_vm2, %v1404_v20, %v1405_v40  ;;  %v1413_v7 = vrot.slane %v3913_v12, 1  ;;  %v1414_v43 = vrot.slane %v1333_v16, 1  ;;  %v1422_v31 = vrot.slane %v3644_v55, 2 }
 0x2c4   :  { %v3921_v19 = vsel %vm272_vm2, %v1419_v57, %v1420_v61  ;;  %v1423_v21 = vrot.slane %v3651_v45, 2  ;;  %v1434_v51 = vrot.slane %v3816_v48, 2  ;;  %v1435_v59 = vrot.slane %v3818_v46, 2 }
 0x2c5   :  { %v3931_v6 = vsel %vm272_vm2, %v1413_v7, %v1414_v43  ;;  %v3942_v13 = vsel %vm321_vm3, %v1428_v25, %v1429_v41  ;;  %v1437_v45 = vrot.slane %v3809_v34, 2  ;;  %v1438_v60 = vrot.slane %v3811_v28, 2 }
 0x2c6   :  { %v1424_v35 = vsel %vm321_vm3, %v1422_v31, %v1423_v21  ;;  %v3948_v4 = vsel %vm321_vm3, %v1434_v51, %v1435_v59  ;;  %v1443_v46 = vrot.slane %v3851_v17, 2  ;;  %v1444_v20 = vrot.slane %v3853_v42, 2 }
 0x2c7   :  { %v1431_v40 = vrot.slane %v3767_v54, 2  ;;  %v1432_v57 = vrot.slane %v3769_v1, 2  ;;  %v3960_v61 = vsel %vm321_vm3, %v1437_v45, %v1438_v60  ;;  %v1446_v42 = vrot.slane %v3669_v9, 2 }
 0x2c8   :  { %v3965_v24 = vsel %vm321_vm3, %v1443_v46, %v1444_v20  ;;  %v1447_v18 = vrot.slane %v3680_v5, 2  ;;  %v1452_v1 = vrot.slane %v3884_v53, 2  ;;  %v1453_v7 = vrot.slane %v3886_v39, 2 }
 0x2c9   :  { %1520 = vrot.lane.b32.xlu2 %v3862_v27, %s2258_s27  ;;  %v3970_v28 = vsel %vm321_vm3, %v1431_v40, %v1432_v57  ;;  %v1440_v25 = vrot.slane %v3799_v14, 2  ;;  %v1441_v41 = vrot.slane %v3801_v23, 2  ;;  %v1455_v39 = vrot.slane %v3845_v15, 2 }
 0x2ca   :  { %1524 = vrot.lane.b32.xlu1 %v3867_v11, %s2258_s27  ;;  %v1448_v43 = vsel %vm321_vm3, %v1446_v42, %v1447_v18  ;;  %v3983_v31 = vsel %vm321_vm3, %v1452_v1, %v1453_v7  ;;  %v1456_v21 = vrot.slane %v3847_v29, 2  ;;  %v1461_v23 = vrot.slane %v3913_v12, 2  ;;  %v1338_v1 = vld [vmem:[#allocation3 + $0x120] sm:$0xff]  ;;  %v1339_v7 = vld [vmem:[#allocation3 + $0x128] sm:$0x3] }
 0x2cb   :  { %1516 = vrot.lane.b32.xlu0 %v3876_v50, %s2258_s27  ;;  %v3988_v5 = vsel %vm321_vm3, %v1440_v25, %v1441_v41  ;;  %v1462_v51 = vrot.slane %v1333_v16, 2  ;;  %v1449_v59 = vrot.slane %v3836_v52, 2  ;;  %v1465_v16 = vrot.slane %v3880_v3, 2  ;;  %v1340_v41 = vld [vmem:[#allocation3 + $0x130] sm:$0xff] }
 0x2cc   :  { %v3998_v45 = vsel %vm321_vm3, %v1455_v39, %v1456_v21  ;;  %v1458_v46 = vrot.slane %v3869_v32, 2  ;;  %v1459_v20 = vrot.slane %v3871_v30, 2  ;;  %v1467_v3 = vrot.slane %v3902_v44, 2  ;;  %v4032_v30 = vpop.permute.xlu2 %1502 }
 0x2cd   :  { %v4003_v60 = vsel %vm321_vm3, %v1461_v23, %v1462_v51  ;;  %v1468_v42 = vrot.slane %v3904_v37, 2  ;;  %v1478_v25 = vrot.slane %v1339_v7, 1  ;;  %v1483_v23 = vrot.slane %v1338_v1, 2 }
 0x2ce   :  { %v4024_v57 = vsel %vm321_vm3, %v1458_v46, %v1459_v20  ;;  %v1484_v51 = vrot.slane %v1339_v7, 2 }
 0x2cf   :  { %v1469_v18 = vsel %vm321_vm3, %v1467_v3, %v1468_v42  ;;  %v1493_v3 = vrot.slane %v1340_v41, 1 }
 0x2d1   :  { %1526 = vrot.lane.b32.xlu2 %v3895_v49, %s2258_s27 }
 0x2d2   :  { %1530 = vrot.lane.b32.xlu1 %v3900_v36, %s2258_s27 }
 0x2d3   :  { %1522 = vrot.lane.b32.xlu0 %v3909_v2, %s2258_s27 }
 0x2d9   :  { %1532 = vrot.lane.b32.xlu2 %v3921_v19, %s2258_s27 }
 0x2da   :  { %1552 = vrot.lane.b32.xlu1 %v3926_v47, %s2260_s0 }
 0x2db   :  { %1528 = vrot.lane.b32.xlu0 %v3931_v6, %s2258_s27  ;;  %s2267_s27 = smov 40  }
 0x2e1   :  { %1554 = vrot.lane.b32.xlu2 %v3942_v13, %s2260_s0 }
 0x2e2   :  { %1558 = vrot.lane.b32.xlu1 %v3948_v4, %s2260_s0 }
 0x2e3   :  { %1550 = vrot.lane.b32.xlu0 %v1424_v35, %s2260_s0  ;;  %v1450_v35 = vrot.slane %v3838_v63, 2  ;;  %v1464_v63 = vrot.slane %v3878_v8, 2 }
 0x2e5   :  { %v4008_v29 = vsel %vm321_vm3, %v1449_v59, %v1450_v35  ;;  %v4017_v40 = vsel %vm321_vm3, %v1464_v63, %v1465_v16  ;;  %v1341_v59 = vld [vmem:[#allocation3 + $0x138] sm:$0x3]  ;;  %v1499_v35 = vrot.slane %v1340_v41, 2  ;;  %v1485_v63 = vsel %vm321_vm3, %v1483_v23, %v1484_v51 }
 0x2e6   :  { %v1500_v46 = vrot.slane %v1341_v59, 2  ;;  %v1494_v42 = vrot.slane %v1341_v59, 1 }
 0x2e8   :  { %v1501_v7 = vsel %vm321_vm3, %v1499_v35, %v1500_v46 }
 0x2e9   :  { %1560 = vrot.lane.b32.xlu2 %v3960_v61, %s2260_s0 }
 0x2ea   :  { %1564 = vrot.lane.b32.xlu1 %v3965_v24, %s2260_s0 }
 0x2eb   :  { %1556 = vrot.lane.b32.xlu0 %v3970_v28, %s2260_s0  ;;  %v1519_v16 = vpop.permute.xlu1 %1518 }
 0x2f1   :  { %1566 = vrot.lane.b32.xlu2 %v1448_v43, %s2260_s0  ;;  %v1477_v43 = vrot.slane %v1338_v1, 1 }
 0x2f2   :  { %1570 = vrot.lane.b32.xlu1 %v3983_v31, %s2260_s0 }
 0x2f3   :  { %1562 = vrot.lane.b32.xlu0 %v3988_v5, %s2260_s0  ;;  %v1479_v39 = vsel %vm272_vm2, %v1477_v43, %v1478_v25  ;;  %v1495_v43 = vsel %vm272_vm2, %v1493_v3, %v1494_v42 }
 0x2f9   :  { %1572 = vrot.lane.b32.xlu2 %v3998_v45, %s2260_s0 }
 0x2fa   :  { %1576 = vrot.lane.b32.xlu1 %v4003_v60, %s2260_s0 }
 0x2fb   :  { %1568 = vrot.lane.b32.xlu0 %v4008_v29, %s2260_s0 }
 0x301   :  { %1578 = vrot.lane.b32.xlu2 %v4017_v40, %s2260_s0 }
 0x302   :  { %1598 = vrot.lane.b32.xlu1 %v3783_v22, %s2263_s23 }
 0x303   :  { %1574 = vrot.lane.b32.xlu0 %v4024_v57, %s2260_s0 }
 0x309   :  { %1600 = vrot.lane.b32.xlu2 %v3775_v26, %s2263_s23 }
 0x30a   :  { %1604 = vrot.lane.b32.xlu1 %v3816_v48, %s2263_s23 }
 0x30b   :  { %1580 = vrot.lane.b32.xlu0 %v1469_v18, %s2260_s0 }
 0x311   :  { %1606 = vrot.lane.b32.xlu2 %v3809_v34, %s2263_s23 }
 0x312   :  { %1628 = vrot.lane.b32.xlu1 %v1338_v1, %s2263_s23 }
 0x313   :  { %1602 = vrot.lane.b32.xlu0 %v3767_v54, %s2263_s23  ;;  %v4043_v37 = vpop.permute.xlu2 %1508 }
 0x319   :  { %1676 = vrot.lane.b32.xlu2 %v1479_v39, %s2262_s22 }
 0x31a   :  { %1772 = vrot.lane.b32.xlu1 %v1340_v41, %s2266_s3 }
 0x31b   :  { %1608 = vrot.lane.b32.xlu0 %v3799_v14, %s2263_s23  ;;  %v4050_v21 = vpop.permute.xlu2 %1514 }
 0x321   :  { %1626 = vrot.lane.b32.xlu2 %v3902_v44, %s2263_s23 }
 0x322   :  { %1674 = vrot.lane.b32.xlu1 %v3921_v19, %s2262_s22 }
 0x323   :  { %1724 = vrot.lane.b32.xlu0 %v1485_v63, %s2267_s27  ;;  %v4058_v20 = vpop.permute.xlu2 %1520 }
 0x329   :  { %1868 = vrot.lane.b32.xlu2 %v1501_v7, %s2268_s15 }
 0x32a   :  { %1770 = vrot.lane.b32.xlu1 %v1338_v1, %s2266_s3 }
 0x32b   :  { %1820 = vrot.lane.b32.xlu0 %v1495_v43, %s2269_s16  ;;  %v4065_v25 = vpop.permute.xlu2 %1526 }
 0x32c   :  { %v1507_v23 = vpop.permute.xlu1 %1506 }
 0x32d   :  { %v1505_v51 = vpop.permute.xlu0 %1504  ;;  %v1888_v1 = vsel %vm802_vm4, %v3775_v26, %v1507_v23 }
 0x32e   :  { %v1887_v10 = vsel %vm802_vm4, %v3783_v22, %v1505_v51  ;;  %v1886_v51 = vsel %vm802_vm4, %v3644_v55, %v4032_v30  ;;  %v1889_v30 = vsel %vm802_vm4, %v3767_v54, %v4043_v37 }
 0x331   :  { %1624 = vrot.lane.b32.xlu2 %v3878_v8, %s2263_s23 }
 0x332   :  { %1672 = vrot.lane.b32.xlu1 %v3900_v36, %s2262_s22 }
 0x333   :  { %1722 = vrot.lane.b32.xlu0 %v1469_v18, %s2267_s27  ;;  %v4072_v41 = vpop.permute.xlu2 %1532 }
 0x334   :  { %v1513_v59 = vpop.permute.xlu1 %1512 }
 0x335   :  { %v1511_v35 = vpop.permute.xlu0 %1510 }
 0x339   :  { %1866 = vrot.lane.b32.xlu2 %v1485_v63, %s2268_s15  ;;  %v1891_v63 = vsel %vm802_vm4, %v3809_v34, %v1513_v59 }
 0x33a   :  { %1768 = vrot.lane.b32.xlu1 %v3902_v44, %s2266_s3 }
 0x33b   :  { %1818 = vrot.lane.b32.xlu0 %v1479_v39, %s2269_s16  ;;  %v1555_v46 = vpop.permute.xlu2 %1554 }
 0x33c   :  { %v4081_v3 = vsel %vm836_vm7, %v1888_v1, %v1555_v46  ;;  %v1525_v42 = vpop.permute.xlu1 %1524  ;;  %v1894_v46 = vsel %vm802_vm4, %v3669_v9, %v1519_v16 }
 0x33d   :  { %v1517_v7 = vpop.permute.xlu0 %1516  ;;  %v1897_v9 = vsel %vm802_vm4, %v3845_v15, %v1525_v42 }
 0x341   :  { %1622 = vrot.lane.b32.xlu2 %v3913_v12, %s2263_s23 }
 0x342   :  { %1670 = vrot.lane.b32.xlu1 %v3931_v6, %s2262_s22 }
 0x343   :  { %1720 = vrot.lane.b32.xlu0 %v4017_v40, %s2267_s27  ;;  %v1561_v43 = vpop.permute.xlu2 %1560 }
 0x344   :  { %v4092_v39 = vsel %vm836_vm7, %v1891_v63, %v1561_v43  ;;  %v4094_v23 = vpop.permute.xlu1 %1530 }
 0x345   :  { %v1523_v1 = vpop.permute.xlu0 %1522 }
 0x349   :  { %1864 = vrot.lane.b32.xlu2 %v1469_v18, %s2268_s15 }
 0x34a   :  { %1766 = vrot.lane.b32.xlu1 %v3878_v8, %s2266_s3 }
 0x34b   :  { %1816 = vrot.lane.b32.xlu0 %v3921_v19, %s2269_s16  ;;  %v1567_v59 = vpop.permute.xlu2 %1566  ;;  %v1890_v19 = vsel %vm802_vm4, %v3816_v48, %v1511_v35 }
 0x34c   :  { %v4106_v63 = vsel %vm836_vm7, %v1894_v46, %v1567_v59  ;;  %v1553_v43 = vpop.permute.xlu1 %1552 }
 0x34d   :  { %v1903_v47 = vsel %vm836_vm7, %v1887_v10, %v1553_v43  ;;  %v1529_v18 = vpop.permute.xlu0 %1528  ;;  %v1893_v43 = vsel %vm802_vm4, %v3851_v17, %v1517_v7  ;;  %v1896_v7 = vsel %vm802_vm4, %v3884_v53, %v1523_v1 }
 0x351   :  { %1620 = vrot.lane.b32.xlu2 %v3869_v32, %s2263_s23 }
 0x352   :  { %1668 = vrot.lane.b32.xlu1 %v3895_v49, %s2262_s22 }
 0x353   :  { %1718 = vrot.lane.b32.xlu0 %v4003_v60, %s2267_s27  ;;  %v1573_v22 = vpop.permute.xlu2 %1572 }
 0x354   :  { %v4120_v16 = vsel %vm836_vm7, %v1897_v9, %v1573_v22  ;;  %v1559_v10 = vpop.permute.xlu1 %1558 }
 0x355   :  { %v1906_v46 = vsel %vm836_vm7, %v1890_v19, %v1559_v10  ;;  %v1551_v59 = vpop.permute.xlu0 %1550  ;;  %v1892_v10 = vsel %vm802_vm4, %v3799_v14, %v4050_v21  ;;  %v1899_v21 = vsel %vm802_vm4, %v3913_v12, %v1529_v18 }
 0x356   :  { %v1902_v42 = vsel %vm836_vm7, %v1886_v51, %v1551_v59 }
 0x359   :  { %1862 = vrot.lane.b32.xlu2 %v4017_v40, %s2268_s15 }
 0x35a   :  { %1764 = vrot.lane.b32.xlu1 %v3913_v12, %s2266_s3 }
 0x35b   :  { %1814 = vrot.lane.b32.xlu0 %v3900_v36, %s2269_s16  ;;  %v4133_v35 = vpop.permute.xlu2 %1578 }
 0x35c   :  { %v1565_v55 = vpop.permute.xlu1 %1564 }
 0x35d   :  { %v4141_v9 = vsel %vm836_vm7, %v1893_v43, %v1565_v55  ;;  %v1557_v40 = vpop.permute.xlu0 %1556 }
 0x35e   :  { %v1905_v22 = vsel %vm836_vm7, %v1889_v30, %v1557_v40  ;;  %v1895_v30 = vsel %vm802_vm4, %v3836_v52, %v4058_v20  ;;  %v1898_v20 = vsel %vm802_vm4, %v3869_v32, %v4065_v25 }
 0x361   :  { %1618 = vrot.lane.b32.xlu2 %v3845_v15, %s2263_s23 }
 0x362   :  { %1666 = vrot.lane.b32.xlu1 %v3867_v11, %s2262_s22 }
 0x363   :  { %1716 = vrot.lane.b32.xlu0 %v4024_v57, %s2267_s27  ;;  %v1601_v36 = vpop.permute.xlu2 %1600 }
 0x364   :  { %v4153_v37 = vsel %vm870_vm8, %v1903_v47, %v1601_v36  ;;  %v1571_v19 = vpop.permute.xlu1 %1570 }
 0x365   :  { %v4159_v51 = vsel %vm836_vm7, %v1896_v7, %v1571_v19  ;;  %v1563_v59 = vpop.permute.xlu0 %1562 }
 0x366   :  { %v4162_v43 = vsel %vm836_vm7, %v1892_v10, %v1563_v59 }
 0x369   :  { %1860 = vrot.lane.b32.xlu2 %v4003_v60, %s2268_s15 }
 0x36a   :  { %1762 = vrot.lane.b32.xlu1 %v3869_v32, %s2266_s3 }
 0x36b   :  { %1812 = vrot.lane.b32.xlu0 %v3931_v6, %s2269_s16  ;;  %v1607_v47 = vpop.permute.xlu2 %1606 }
 0x36c   :  { %v4173_v1 = vsel %vm870_vm8, %v1906_v46, %v1607_v47  ;;  %v1577_v55 = vpop.permute.xlu1 %1576 }
 0x36d   :  { %v4179_v60 = vsel %vm836_vm7, %v1899_v21, %v1577_v55  ;;  %v1569_v40 = vpop.permute.xlu0 %1568 }
 0x36e   :  { %v4182_v36 = vsel %vm836_vm7, %v1895_v30, %v1569_v40 }
 0x371   :  { %1616 = vrot.lane.b32.xlu2 %v3884_v53, %s2263_s23 }
 0x372   :  { %1664 = vrot.lane.b32.xlu1 %v3909_v2, %s2262_s22 }
 0x373   :  { %1714 = vrot.lane.b32.xlu0 %v3998_v45, %s2267_s27  ;;  %v1677_v12 = vpop.permute.xlu2 %1676 }
 0x374   :  { %v1599_v6 = vpop.permute.xlu1 %1598 }
 0x375   :  { %v4194_v18 = vsel %vm870_vm8, %v1902_v42, %v1599_v6  ;;  %v1575_v46 = vpop.permute.xlu0 %1574 }
 0x376   :  { %v4197_v7 = vsel %vm836_vm7, %v1898_v20, %v1575_v46  ;;  %v1320_v20 = vld [vmem:[#allocation3 + $0x90] sm:$0xff] }
 0x379   :  { %1858 = vrot.lane.b32.xlu2 %v4024_v57, %s2268_s15 }
 0x37a   :  { %1760 = vrot.lane.b32.xlu1 %v3845_v15, %s2266_s3 }
 0x37b   :  { %1810 = vrot.lane.b32.xlu0 %v3895_v49, %s2269_s16  ;;  %v4205_v19 = vpop.permute.xlu2 %1626 }
 0x37c   :  { %v1605_v10 = vpop.permute.xlu1 %1604 }
 0x37d   :  { %v4208_v32 = vsel %vm870_vm8, %v1905_v22, %v1605_v10  ;;  %v1581_v25 = vpop.permute.xlu0 %1580  ;;  %v1319_v22 = vld [vmem:[#allocation3 + $0x88] sm:$0x3] }
 0x37e   :  { %v1475_v55 = vrot.slane %v1319_v22, 1 }
 0x381   :  { %1614 = vrot.lane.b32.xlu2 %v3836_v52, %s2263_s23  ;;  %v1318_v52 = vld [vmem:[#allocation3 + $0x80] sm:$0xff] }
 0x382   :  { %1662 = vrot.lane.b32.xlu1 %v3862_v27, %s2262_s22  ;;  %v1474_v21 = vrot.slane %v1318_v52, 1 }
 0x383   :  { %1712 = vrot.lane.b32.xlu0 %v3983_v31, %s2267_s27  ;;  %v1869_v15 = vpop.permute.xlu2 %1868 }
 0x384   :  { %v1629_v57 = vpop.permute.xlu1 %1628 }
 0x385   :  { %v1603_v42 = vpop.permute.xlu0 %1602 }
 0x386   :  { %v4218_v49 = vsel %vm870_vm8, %v4081_v3, %v1603_v42 }
 0x389   :  { %1856 = vrot.lane.b32.xlu2 %v3998_v45, %s2268_s15  ;;  %v1476_v45 = vsel %vm272_vm2, %v1474_v21, %v1475_v55 }
 0x38a   :  { %1758 = vrot.lane.b32.xlu1 %v3884_v53, %s2266_s3  ;;  %v1901_v53 = vsel %vm802_vm4, %v3902_v44, %v4072_v41 }
 0x38b   :  { %1808 = vrot.lane.b32.xlu0 %v3867_v11, %s2269_s16  ;;  %v4226_v27 = vpop.permute.xlu2 %1624  ;;  %v1917_v40 = vsel %vm836_vm7, %v1901_v53, %v1581_v25  ;;  %v1490_v53 = vrot.slane %v1320_v20, 1 }
 0x38c   :  { %v1773_v59 = vpop.permute.xlu1 %1772 }
 0x38d   :  { %v1609_v47 = vpop.permute.xlu0 %1608 }
 0x38e   :  { %v4230_v3 = vsel %vm870_vm8, %v4092_v39, %v1609_v47  ;;  %v1933_v39 = vsel %vm870_vm8, %v1917_v40, %v1629_v57  ;;  %v1481_v57 = vrot.slane %v1319_v22, 2  ;;  %v1321_v47 = vld [vmem:[#allocation3 + $0x98] sm:$0x3] }
 0x38f   :  { %v1949_v46 = vsel %vm904_vm11, %v1933_v39, %v1677_v12  ;;  %v1480_v12 = vrot.slane %v1318_v52, 2  ;;  %v1497_v21 = vrot.slane %v1321_v47, 2  ;;  %v1491_v40 = vrot.slane %v1321_v47, 1 }
 0x391   :  { %1612 = vrot.lane.b32.xlu2 %v1318_v52, %s2263_s23 }
 0x392   :  { %1660 = vrot.lane.b32.xlu1 %v1476_v45, %s2262_s22 }
 0x393   :  { %1710 = vrot.lane.b32.xlu0 %v4008_v29, %s2267_s27  ;;  %v1867_v11 = vpop.permute.xlu2 %1866 }
 0x394   :  { %v1675_v30 = vpop.permute.xlu1 %1674 }
 0x395   :  { %v1725_v6 = vpop.permute.xlu0 %1724 }
 0x396   :  { %v1966_v29 = vsel %vm1950_vm5, %v1949_v46, %v1725_v6  ;;  %v1900_v6 = vsel %vm802_vm4, %v3878_v8, %v4094_v23 }
 0x397   :  { %v1983_v10 = vsel %vm1967_vm6, %v1966_v29, %v1773_v59  ;;  %v1482_v59 = vsel %vm321_vm3, %v1480_v12, %v1481_v57  ;;  %v1916_v46 = vsel %vm836_vm7, %v1900_v6, %v4133_v35 }
 0x398   :  { %v1932_v29 = vsel %vm870_vm8, %v1916_v46, %v4205_v19 }
 0x399   :  { %1854 = vrot.lane.b32.xlu2 %v3983_v31, %s2268_s15 }
 0x39a   :  { %1756 = vrot.lane.b32.xlu1 %v1320_v20, %s2266_s3 }
 0x39b   :  { %1806 = vrot.lane.b32.xlu0 %v3909_v2, %s2269_s16  ;;  %v4249_v44 = vpop.permute.xlu2 %1622  ;;  %v1496_v2 = vrot.slane %v1320_v20, 2 }
 0x39c   :  { %v1771_v41 = vpop.permute.xlu1 %1770 }
 0x39d   :  { %v1821_v25 = vpop.permute.xlu0 %1820  ;;  %v1498_v39 = vsel %vm321_vm3, %v1496_v2, %v1497_v21 }
 0x39e   :  { %v2000_v31 = vsel %vm1984_vm9, %v1983_v10, %v1821_v25  ;;  %v1492_v10 = vsel %vm272_vm2, %v1490_v53, %v1491_v40  ;;  %v1948_v25 = vsel %vm904_vm11, %v1932_v29, %v1675_v30 }
 0x39f   :  { %v2017_v42 = vsel %vm2001_vm10, %v2000_v31, %v1869_v15 }
 0x3a0   :  { %2198 = vmatpush.xpose.msk.msra.mxu1 %vm2019_vm12, %v2017_v42 }
 0x3a1   :  { %1610 = vrot.lane.b32.xlu2 %v3851_v17, %s2263_s23 }
 0x3a2   :  { %1658 = vrot.lane.b32.xlu1 %v3876_v50, %s2262_s22 }
 0x3a3   :  { %1708 = vrot.lane.b32.xlu0 %v1482_v59, %s2267_s27  ;;  %v1865_v55 = vpop.permute.xlu2 %1864 }
 0x3a4   :  { %v1673_v22 = vpop.permute.xlu1 %1672 }
 0x3a5   :  { %v1723_v15 = vpop.permute.xlu0 %1722 }
 0x3a6   :  { %v1965_v20 = vsel %vm1950_vm5, %v1948_v25, %v1723_v15 }
 0x3a7   :  { %v1982_v12 = vsel %vm1967_vm6, %v1965_v20, %v1771_v41  ;;  %v1931_v41 = vsel %vm870_vm8, %v4179_v60, %v4226_v27 }
 0x3a8   :  { %v1947_v42 = vsel %vm904_vm11, %v1931_v41, %v1673_v22  ;;  %v1930_v22 = vsel %vm870_vm8, %v4197_v7, %v4249_v44 }
 0x3a9   :  { %1852 = vrot.lane.b32.xlu2 %v1498_v39, %s2268_s15 }
 0x3aa   :  { %1754 = vrot.lane.b32.xlu1 %v1318_v52, %s2266_s3 }
 0x3ab   :  { %1804 = vrot.lane.b32.xlu0 %v1492_v10, %s2269_s16  ;;  %v1621_v8 = vpop.permute.xlu2 %1620 }
 0x3ac   :  { %v1769_v23 = vpop.permute.xlu1 %1768  ;;  %v1929_v29 = vsel %vm870_vm8, %v4120_v16, %v1621_v8 }
 0x3ad   :  { %v1819_v35 = vpop.permute.xlu0 %1818 }
 0x3ae   :  { %v1999_v31 = vsel %vm1984_vm9, %v1982_v12, %v1819_v35 }
 0x3af   :  { %v2016_v19 = vsel %vm2001_vm10, %v1999_v31, %v1867_v11 }
 0x3b0   :  { %2199 = vmatpush.xpose.msk.msra.mxu1 %vm2019_vm12, %v2016_v19 }
 0x3b1   :  { %1802 = vrot.lane.b32.xlu2 %v1476_v45, %s2269_s16 }
 0x3b2   :  { %1850 = vrot.lane.b32.xlu1 %v1482_v59, %s2268_s15 }
 0x3b3   :  { %1706 = vrot.lane.b32.xlu0 %v3965_v24, %s2267_s27  ;;  %v1863_v52 = vpop.permute.xlu2 %1862 }
 0x3b4   :  { %v1671_v30 = vpop.permute.xlu1 %1670 }
 0x3b5   :  { %v1721_v57 = vpop.permute.xlu0 %1720 }
 0x3b6   :  { %v1964_v11 = vsel %vm1950_vm5, %v1947_v42, %v1721_v57 }
 0x3b7   :  { %v1981_v2 = vsel %vm1967_vm6, %v1964_v11, %v1769_v23 }
 0x3b9   :  { %1704 = vrot.lane.b32.xlu2 %v3988_v5, %s2267_s27 }
 0x3ba   :  { %1800 = vrot.lane.b32.xlu1 %v3876_v50, %s2269_s16 }
 0x3bb   :  { %1656 = vrot.lane.b32.xlu0 %v3829_v58, %s2262_s22  ;;  %v1619_v45 = vpop.permute.xlu2 %1618 }
 0x3bc   :  { %v1767_v47 = vpop.permute.xlu1 %1766  ;;  %v1928_v12 = vsel %vm870_vm8, %v4159_v51, %v1619_v45 }
 0x3bd   :  { %v1817_v59 = vpop.permute.xlu0 %1816 }
 0x3be   :  { %v1998_v60 = vsel %vm1984_vm9, %v1981_v2, %v1817_v59 }
 0x3bf   :  { %v2015_v27 = vsel %vm2001_vm10, %v1998_v60, %v1865_v55  ;;  %v1946_v55 = vsel %vm904_vm11, %v1930_v22, %v1671_v30 }
 0x3c0   :  { %2200 = vmatpush.xpose.msk.msra.mxu1 %vm2019_vm12, %v2015_v27 }
 0x3c1   :  { %1654 = vrot.lane.b32.xlu2 %v3834_v56, %s2262_s22 }
 0x3c2   :  { %1702 = vrot.lane.b32.xlu1 %v3960_v61, %s2267_s27 }
 0x3c3   :  { %1752 = vrot.lane.b32.xlu0 %v3851_v17, %s2266_s3  ;;  %v1861_v50 = vpop.permute.xlu2 %1860 }
 0x3c4   :  { %v1669_v21 = vpop.permute.xlu1 %1668 }
 0x3c5   :  { %v1719_v53 = vpop.permute.xlu0 %1718  ;;  %v1945_v10 = vsel %vm904_vm11, %v1929_v29, %v1669_v21 }
 0x3c6   :  { %v1963_v40 = vsel %vm1950_vm5, %v1946_v55, %v1719_v53 }
 0x3c7   :  { %v1980_v6 = vsel %vm1967_vm6, %v1963_v40, %v1767_v47 }
 0x3c9   :  { %1750 = vrot.lane.b32.xlu2 %v3799_v14, %s2266_s3 }
 0x3ca   :  { %1652 = vrot.lane.b32.xlu1 %v3843_v62, %s2262_s22 }
 0x3cb   :  { %1848 = vrot.lane.b32.xlu0 %v3965_v24, %s2268_s15  ;;  %v1617_v17 = vpop.permute.xlu2 %1616 }
 0x3cc   :  { %v1765_v15 = vpop.permute.xlu1 %1764  ;;  %v1927_v11 = vsel %vm870_vm8, %v4182_v36, %v1617_v17 }
 0x3cd   :  { %v1815_v39 = vpop.permute.xlu0 %1814 }
 0x3ce   :  { %v1997_v7 = vsel %vm1984_vm9, %v1980_v6, %v1815_v39 }
 0x3cf   :  { %v2014_v44 = vsel %vm2001_vm10, %v1997_v7, %v1863_v52 }
 0x3d0   :  { %2201 = vmatpush.xpose.msk.msra.mxu1 %vm2019_vm12, %v2014_v44 }
 0x3d1   :  { %1846 = vrot.lane.b32.xlu2 %v3988_v5, %s2268_s15 }
 0x3d2   :  { %1748 = vrot.lane.b32.xlu1 %v3809_v34, %s2266_s3 }
 0x3d3   :  { %1798 = vrot.lane.b32.xlu0 %v3829_v58, %s2269_s16  ;;  %v1859_v14 = vpop.permute.xlu2 %1858 }
 0x3d4   :  { %v1667_v24 = vpop.permute.xlu1 %1666 }
 0x3d5   :  { %v1717_v46 = vpop.permute.xlu0 %1716  ;;  %v1944_v35 = vsel %vm904_vm11, %v1928_v12, %v1667_v24 }
 0x3d6   :  { %v1962_v25 = vsel %vm1950_vm5, %v1945_v10, %v1717_v46 }
 0x3d7   :  { %v1979_v5 = vsel %vm1967_vm6, %v1962_v25, %v1765_v15 }
 0x3d9   :  { %1796 = vrot.lane.b32.xlu2 %v3834_v56, %s2269_s16 }
 0x3da   :  { %1844 = vrot.lane.b32.xlu1 %v3960_v61, %s2268_s15 }
 0x3db   :  { %1700 = vrot.lane.b32.xlu0 %v3948_v4, %s2267_s27  ;;  %v1615_v34 = vpop.permute.xlu2 %1614 }
 0x3dc   :  { %v1763_v58 = vpop.permute.xlu1 %1762 }
 0x3dd   :  { %v1813_v20 = vpop.permute.xlu0 %1812 }
 0x3de   :  { %v1996_v16 = vsel %vm1984_vm9, %v1979_v5, %v1813_v20 }
 0x3df   :  { %v2013_v8 = vsel %vm2001_vm10, %v1996_v16, %v1861_v50 }
 0x3e0   :  { %2202 = vmatpush.xpose.msk.msra.mxu1 %vm2019_vm12, %v2013_v8 }
 0x3e1   :  { %1698 = vrot.lane.b32.xlu2 %v3970_v28, %s2267_s27 }
 0x3e2   :  { %1794 = vrot.lane.b32.xlu1 %v3843_v62, %s2269_s16 }
 0x3e3   :  { %1650 = vrot.lane.b32.xlu0 %v3789_v33, %s2262_s22  ;;  %v1857_v56 = vpop.permute.xlu2 %1856 }
 0x3e4   :  { %v1665_v61 = vpop.permute.xlu1 %1664 }
 0x3e5   :  { %v1715_v23 = vpop.permute.xlu0 %1714  ;;  %v1943_v45 = vsel %vm904_vm11, %v1927_v11, %v1665_v61 }
 0x3e6   :  { %v1961_v31 = vsel %vm1950_vm5, %v1944_v35, %v1715_v23 }
 0x3e7   :  { %v1978_v52 = vsel %vm1967_vm6, %v1961_v31, %v1763_v58 }
 0x3e9   :  { %1648 = vrot.lane.b32.xlu2 %v3797_v0, %s2262_s22 }
 0x3ea   :  { %1696 = vrot.lane.b32.xlu1 %v3942_v13, %s2267_s27 }
 0x3eb   :  { %1746 = vrot.lane.b32.xlu0 %v3816_v48, %s2266_s3  ;;  %v1613_v62 = vpop.permute.xlu2 %1612 }
 0x3ec   :  { %v1761_v19 = vpop.permute.xlu1 %1760  ;;  %v1925_v6 = vsel %vm870_vm8, %v4141_v9, %v1613_v62 }
 0x3ed   :  { %v1811_v30 = vpop.permute.xlu0 %1810 }
 0x3ee   :  { %v1995_v51 = vsel %vm1984_vm9, %v1978_v52, %v1811_v30 }
 0x3ef   :  { %v2012_v57 = vsel %vm2001_vm10, %v1995_v51, %v1859_v14 }
 0x3f0   :  { %2203 = vmatpush.xpose.msk.msra.mxu1 %vm2019_vm12, %v2012_v57 }
 0x3f1   :  { %1744 = vrot.lane.b32.xlu2 %v3767_v54, %s2266_s3 }
 0x3f2   :  { %1646 = vrot.lane.b32.xlu1 %v3807_v38, %s2262_s22 }
 0x3f3   :  { %1842 = vrot.lane.b32.xlu0 %v3948_v4, %s2268_s15  ;;  %v1855_v42 = vpop.permute.xlu2 %1854 }
 0x3f4   :  { %v1663_v48 = vpop.permute.xlu1 %1662 }
 0x3f5   :  { %v1713_v41 = vpop.permute.xlu0 %1712 }
 0x3f6   :  { %v1960_v47 = vsel %vm1950_vm5, %v1943_v45, %v1713_v41 }
 0x3f7   :  { %v1977_v38 = vsel %vm1967_vm6, %v1960_v47, %v1761_v19 }
 0x3f9   :  { %1840 = vrot.lane.b32.xlu2 %v3970_v28, %s2268_s15  ;;  %v4552_v28 = vld [vmem:[#allocation10_spill] sm:$0xff] }
 0x3fa   :  { %1742 = vrot.lane.b32.xlu1 %v3775_v26, %s2266_s3 }
 0x3fb   :  { %1792 = vrot.lane.b32.xlu0 %v3789_v33, %s2269_s16  ;;  %v1611_v59 = vpop.permute.xlu2 %1610  ;;  %v1926_v33 = vsel %vm870_vm8, %v4106_v63, %v1615_v34 }
 0x3fc   :  { %v1759_v54 = vpop.permute.xlu1 %1758  ;;  %v1942_v27 = vsel %vm904_vm11, %v1926_v33, %v1663_v48  ;;  %v1924_v10 = vsel %vm870_vm8, %v4162_v43, %v1611_v59 }
 0x3fd   :  { %v1809_v4 = vpop.permute.xlu0 %1808 }
 0x3fe   :  { %v1994_v2 = vsel %vm1984_vm9, %v1977_v38, %v1809_v4 }
 0x3ff   :  { %v2011_v36 = vsel %vm2001_vm10, %v1994_v2, %v1857_v56 }
 0x400   :  { %2204 = vmatpush.xpose.msk.msra.mxu1 %vm2019_vm12, %v2011_v36 }
 0x401   :  { %1790 = vrot.lane.b32.xlu2 %v3797_v0, %s2269_s16 }
 0x403   :  { %1694 = vrot.lane.b32.xlu0 %v4552_v28, %s2267_s27  ;;  %v1853_v50 = vpop.permute.xlu2 %1852 }
 0x404   :  { %v1661_v26 = vpop.permute.xlu1 %1660 }
 0x405   :  { %v1711_v60 = vpop.permute.xlu0 %1710  ;;  %v1941_v39 = vsel %vm904_vm11, %v1925_v6, %v1661_v26 }
 0x406   :  { %v1959_v21 = vsel %vm1950_vm5, %v1942_v27, %v1711_v60 }
 0x407   :  { %v1976_v22 = vsel %vm1967_vm6, %v1959_v21, %v1759_v54 }
 0x40b   :  { %1838 = vrot.lane.b32.xlu0 %v3942_v13, %s2268_s15  ;;  %v1803_v17 = vpop.permute.xlu2 %1802 }
 0x40c   :  { %v1757_v53 = vpop.permute.xlu1 %1756 }
 0x40d   :  { %v1807_v0 = vpop.permute.xlu0 %1806 }
 0x40e   :  { %v1993_v55 = vsel %vm1984_vm9, %v1976_v22, %v1807_v0 }
 0x40f   :  { %v2010_v40 = vsel %vm2001_vm10, %v1993_v55, %v1855_v42 }
 0x410   :  { %2205 = vmatpush.xpose.msk.msra.mxu1 %vm2019_vm12, %v2010_v40 }
 0x413   :  { %v1705_v24 = vpop.permute.xlu2 %1704 }
 0x414   :  { %v1659_v63 = vpop.permute.xlu1 %1658 }
 0x415   :  { %v1709_v15 = vpop.permute.xlu0 %1708  ;;  %v1940_v9 = vsel %vm904_vm11, %v1924_v10, %v1659_v63 }
 0x416   :  { %v1958_v13 = vsel %vm1950_vm5, %v1941_v39, %v1709_v15 }
 0x417   :  { %v1975_v44 = vsel %vm1967_vm6, %v1958_v13, %v1757_v53 }
 0x41b   :  { %v1655_v20 = vpop.permute.xlu2 %1654 }
 0x41c   :  { %v1755_v7 = vpop.permute.xlu1 %1754  ;;  %v1938_v48 = vsel %vm904_vm11, %v4173_v1, %v1655_v20  ;;  %v2092_v20 = vld [vmem:[%s4472_s6] sm:$0xff] }
 0x41d   :  { %v1805_v14 = vpop.permute.xlu0 %1804 }
 0x41e   :  { %v1992_v46 = vsel %vm1984_vm9, %v1975_v44, %v1805_v14 }
 0x41f   :  { %v2009_v29 = vsel %vm2001_vm10, %v1992_v46, %v1853_v50 }
 0x420   :  { %2206 = vmatpush.xpose.msk.msra.mxu1 %vm2019_vm12, %v2009_v29 }
 0x423   :  { %v1751_v23 = vpop.permute.xlu2 %1750 }
 0x424   :  { %v1851_v25 = vpop.permute.xlu1 %1850 }
 0x425   :  { %v1707_v34 = vpop.permute.xlu0 %1706 }
 0x426   :  { %v1957_v58 = vsel %vm1950_vm5, %v1940_v9, %v1707_v34 }
 0x427   :  { %v1974_v5 = vsel %vm1967_vm6, %v1957_v58, %v1755_v7  ;;  %v2018_v58 = vld [vmem:[%s4470_s4] sm:$0xff] }
 0x428   :  { %v1991_v16 = vsel %vm1984_vm9, %v1974_v5, %v1803_v17  ;;  %v2270_v5 = vmov 0  }
 0x429   :  { %v2008_v8 = vsel %vm2001_vm10, %v1991_v16, %v1851_v25  ;;  %2240 = vset.pattern.permute.xlu0 %v2270_v5 }
 0x42a   :  { %2207 = vmatpush.xpose.msk.msra.mxu1 %vm2019_vm12, %v2008_v8 }
 0x42b   :  { %v1847_v19 = vpop.permute.xlu2 %1846 }
 0x42c   :  { %v1801_v56 = vpop.permute.xlu1 %1800 }
 0x42d   :  { %v1657_v61 = vpop.permute.xlu0 %1656 }
 0x42e   :  { %v1939_v35 = vsel %vm904_vm11, %v4230_v3, %v1657_v61  ;;  %v4553_v61 = vld [vmem:[#allocation22_spill] sm:$0xff] }
 0x42f   :  { %v1956_v31 = vsel %vm1950_vm5, %v1939_v35, %v1705_v24 }
 0x433   :  { %v1797_v11 = vpop.permute.xlu2 %1796 }
 0x434   :  { %v1703_v12 = vpop.permute.xlu1 %1702 }
 0x435   :  { %v1753_v43 = vpop.permute.xlu0 %1752  ;;  %v1955_v41 = vsel %vm1950_vm5, %v1938_v48, %v1703_v12 }
 0x436   :  { %v1973_v62 = vsel %vm1967_vm6, %v1956_v31, %v1753_v43  ;;  %v1972_v3 = vsel %vm1967_vm6, %v1955_v41, %v1751_v23 }
 0x437   :  { %v1990_v51 = vsel %vm1984_vm9, %v1973_v62, %v1801_v56 }
 0x43b   :  { %v1699_v36 = vpop.permute.xlu2 %1698 }
 0x43c   :  { %v1653_v52 = vpop.permute.xlu1 %1652 }
 0x43d   :  { %v1849_v30 = vpop.permute.xlu0 %1848  ;;  %v1937_v38 = vsel %vm904_vm11, %v4208_v32, %v1653_v52 }
 0x43e   :  { %v2007_v57 = vsel %vm2001_vm10, %v1990_v51, %v1849_v30 }
 0x43f   :  { %2208 = vmatpush.xpose.msk.msra.mxu1 %vm2019_vm12, %v2007_v57 }
 0x443   :  { %v1649_v33 = vpop.permute.xlu2 %1648 }
 0x444   :  { %v1749_v45 = vpop.permute.xlu1 %1748  ;;  %v1935_v63 = vsel %vm904_vm11, %v4153_v37, %v1649_v33 }
 0x445   :  { %v1799_v42 = vpop.permute.xlu0 %1798 }
 0x446   :  { %v1989_v47 = vsel %vm1984_vm9, %v1972_v3, %v1799_v42 }
 0x447   :  { %v2006_v54 = vsel %vm2001_vm10, %v1989_v47, %v1847_v19 }
 0x448   :  { %2209 = vmatpush.xpose.msk.msra.mxu1 %vm2019_vm12, %v2006_v54 }
 0x44b   :  { %v1745_v22 = vpop.permute.xlu2 %1744 }
 0x44c   :  { %v1845_v59 = vpop.permute.xlu1 %1844 }
 0x44d   :  { %v1701_v4 = vpop.permute.xlu0 %1700 }
 0x44e   :  { %v1954_v2 = vsel %vm1950_vm5, %v1937_v38, %v1701_v4 }
 0x44f   :  { %v1971_v1 = vsel %vm1967_vm6, %v1954_v2, %v1749_v45 }
 0x450   :  { %v1988_v28 = vsel %vm1984_vm9, %v1971_v1, %v1797_v11 }
 0x451   :  { %v2005_v26 = vsel %vm2001_vm10, %v1988_v28, %v1845_v59 }
 0x452   :  { %2210 = vmatpush.xpose.msk.msra.mxu1 %vm2019_vm12, %v2005_v26 }
 0x453   :  { %v1841_v39 = vpop.permute.xlu2 %1840 }
 0x454   :  { %v1795_v27 = vpop.permute.xlu1 %1794 }
 0x455   :  { %v1651_v60 = vpop.permute.xlu0 %1650 }
 0x456   :  { %v1936_v32 = vsel %vm904_vm11, %v4218_v49, %v1651_v60 }
 0x457   :  { %v1953_v21 = vsel %vm1950_vm5, %v1936_v32, %v1699_v36 }
 0x45b   :  { %v1791_v10 = vpop.permute.xlu2 %1790 }
 0x45c   :  { %v1697_v0 = vpop.permute.xlu1 %1696 }
 0x45d   :  { %v1747_v50 = vpop.permute.xlu0 %1746  ;;  %v1952_v15 = vsel %vm1950_vm5, %v1935_v63, %v1697_v0 }
 0x45e   :  { %v1970_v53 = vsel %vm1967_vm6, %v1953_v21, %v1747_v50  ;;  %v1969_v49 = vsel %vm1967_vm6, %v1952_v15, %v1745_v22 }
 0x45f   :  { %v1987_v40 = vsel %vm1984_vm9, %v1970_v53, %v1795_v27 }
 0x464   :  { %v1647_v7 = vpop.permute.xlu1 %1646 }
 0x465   :  { %v1843_v55 = vpop.permute.xlu0 %1842  ;;  %v1934_v24 = vsel %vm904_vm11, %v4194_v18, %v1647_v7  ;;  %v2091_v18 = vld [vmem:[%s4471_s5] sm:$0xff] }
 0x466   :  { %v2004_v17 = vsel %vm2001_vm10, %v1987_v40, %v1843_v55  ;;  %2117 = vperm.xlu0 %2240, %v2091_v18  }
 0x467   :  { %2211 = vmatpush.xpose.msk.msra.mxu1 %vm2019_vm12, %v2004_v17 }
 0x46c   :  { %v1743_v37 = vpop.permute.xlu1 %1742 }
 0x46d   :  { %v1793_v6 = vpop.permute.xlu0 %1792 }
 0x46e   :  { %v1986_v13 = vsel %vm1984_vm9, %v1969_v49, %v1793_v6  ;;  %2123 = vperm.xlu0 %2240, %v2092_v20  }
 0x46f   :  { %v2003_v44 = vsel %vm2001_vm10, %v1986_v13, %v1841_v39 }
 0x470   :  { %2212 = vmatpush.xpose.msk.msra.mxu1 %vm2019_vm12, %v2003_v44 }
 0x475   :  { %v1695_v14 = vpop.permute.xlu0 %1694 }
 0x476   :  { %v1951_v46 = vsel %vm1950_vm5, %v1934_v24, %v1695_v14 }
 0x477   :  { %v1968_v29 = vsel %vm1967_vm6, %v1951_v46, %v1743_v37 }
 0x478   :  { %v1985_v9 = vsel %vm1984_vm9, %v1968_v29, %v1791_v10 }
 0x47d   :  { %v1839_v25 = vpop.permute.xlu0 %1838 }
 0x47e   :  { %v2002_v34 = vsel %vm2001_vm10, %v1985_v9, %v1839_v25 }
 0x47f   :  { %2213 = vmatpush.xpose.msk.msra.mxu1 %vm2019_vm12, %v2002_v34 }
 0x482   :  { %2214 = vmatmul.msk.f32.vlgmr.msra.gmra.mxu1 %vm2019_vm12, %v2018_v58 }
 0x4d8   :  { %v2118_v57 = vpop.permute.xlu0 %2117 }
 0x4e0   :  { %v2124_v47 = vpop.permute.xlu0 %2123 }
 0x4ff   :  { %v2088_v16 = vpop.f32.mrf.mxu1 }
 0x500   :  { %v2095_v8 = vmul.f32 %v2088_v16, %v2088_v16  ;;  %2093 = vadd.xlane.f32.xlu1 %v2088_v16 }
 0x502   :  { %2096 = vadd.xlane.f32.xlu2 %v2095_v8 }
 0x573   :  { %v2094_v56 = vpop.xlane.xlu1 %2093 }
 0x574   :  { %v2098_v23 = vmul.f32 %v2094_v56, %v4553_v61 }
 0x575   :  { %v2097_v12 = vpop.xlane.xlu2 %2096 }
 0x576   :  { %v2100_v43 = vmul.f32 %v2098_v23, %v2098_v23  ;;  %v2099_v35 = vmul.f32 %v2097_v12, %v4553_v61  ;;  %v2113_v3 = vsub.f32 %v2088_v16, %v2098_v23 }
 0x578   :  { %v2101_v31 = vsub.f32 %v2099_v35, %v2100_v43 }
 0x57a   :  { %v2102_v62 = vadd.f32 1e-05, %v2101_v31 }
 0x57c   :  { %2247 = vrsqrt.f32 %v2102_v62  ;;  %vm2109_vm3 = vweird.f32 %v2102_v62 }
 0x582   :  { %v2248_v19 = vpop.eup %2247 }
 0x583   :  { %v2104_v52 = vmul.f32 %v2248_v19, %v2102_v62  ;;  %vm2110_vm2 = vweird.f32 %v2248_v19 }
 0x584   :  { %vm2111_vm4 = vmor %vm2109_vm3, %vm2110_vm2 }
 0x585   :  { %v2105_v30 = vmul.f32 %v2248_v19, %v2104_v52 }
 0x587   :  { %v2106_v51 = vmul.f32 0.5, %v2105_v30 }
 0x589   :  { %v2107_v48 = vsub.f32 1.5, %v2106_v51 }
 0x58b   :  { %v2108_v41 = vmul.f32 %v2248_v19, %v2107_v48 }
 0x58d   :  { %v2112_v42 = vsel %vm2111_vm4, %v2248_v19, %v2108_v41 }
 0x58e   :  { %v2114_v11 = vmul.f32 %v2113_v3, %v2112_v42 }
 0x590   :  { %v2120_v45 = vmul.f32 %v2118_v57, %v2114_v11 }
 0x592   :  { %v2126_v54 = vadd.f32 %v2124_v47, %v2120_v45 }
 0x594   :  { %v2127_v38 = vmax.f32 %v2126_v54, 0.0 }
 0x596   :  { %2128 = vst [vmem:[%s4473_s7] sm:$0xff] %v2127_v38 }

</bundles_post_ra>
